<compile_context>
chip_gen: v6e
topology: v6e:2x2x1
jax: 0.10.0
libtpu: 0.0.40
codegen_flags: <defaults>
</compile_context>

<pallas_src>
import functools

import jax
import jax.numpy as jnp
from jax.experimental import pallas as pl
from jax.experimental.pallas import tpu as pltpu

# ---------------- module hyper-parameters (small, lane-aligned) ----------------
NUM_EMBEDDINGS = 128     # K: number of codes
EMBEDDING_DIM = 128      # D: quantization space dimensionality
COMMITMENT_COST = 0.25
IN_T = 32                # time
IN_B = 4                 # batch
# Module input layout (what VectorQuantizer.forward receives): (embedding_dim, time, batch).
# forward() permutes it to (T, B, D) and flattens to (N, D), N = T*B (time-major).


# ================================ Pallas kernel ================================

def _vq_kernel(x_ref, emb_ref,
               q_ref, dist_ref, enc_ref, idx_ref, stats_ref,
               *, commitment_cost, num_embeddings):
    x_dn = x_ref[...]                  # (D, N) f32 inputs, already in "codebook-dim first" layout
    e = emb_ref[...]                   # (K, D) f32 codebook
    d, n = x_dn.shape
    k = e.shape[0]

    # --- squared L2 distances, computed transposed (K, N) ---------------------------------
    # dist_T[k, n] = ||e_k||^2 + ||x_n||^2 - 2 <e_k, x_n>.  Both rank-1 terms broadcast
    # natively ((K,1) over lanes, (1,N) over sublanes) and the matmul is a plain e @ x.
    e_sq = jnp.sum(e * e, axis=1, keepdims=True)                         # (K, 1) lane-reduce
    x_sq = jnp.sum(x_dn * x_dn, axis=0, keepdims=True)                   # (1, N) sublane-reduce
    ex = jnp.dot(e, x_dn, preferred_element_type=jnp.float32)            # (K, N) MXU matmul
    dist_t = e_sq + x_sq - 2.0 * ex                                      # (K, N)
    dist_ref[...] = jnp.transpose(dist_t)                                # (N, K) lane-dense store

    # --- argmin over the codebook (first minimal index, like torch.argmin) ----------------
    # Reuses the per-row minimum (needed below for e_latent) and produces the indices
    # directly as a lane-dense (1, N) row.
    d_min = jnp.min(dist_t, axis=0, keepdims=True)                       # (1, N)
    k_iota = jax.lax.broadcasted_iota(jnp.int32, (k, n), 0).astype(jnp.float32)
    cand = jnp.where(dist_t == d_min, k_iota, float(num_embeddings))
    idx_row = jnp.min(cand, axis=0, keepdims=True)                       # (1, N), exact small ints
    idx_ref[...] = idx_row.astype(jnp.int32)

    # --- one-hot encodings and quantized = codebook lookup (second MXU matmul) ------------
    enc_t = (k_iota == idx_row).astype(jnp.float32)                      # (K, N) one-hot columns
    enc_ref[...] = jnp.transpose(enc_t)                                  # (N, K) output
    # q_T[d, n] = sum_k e[k, d] * enc_t[k, n]  -> quantized directly in (D, N) layout,
    # so the wrapper's output is a free reshape to (D, T, B) (no XLA transpose).
    q_t = jax.lax.dot_general(e, enc_t, (((0,), (0,)), ((), ())),
                              preferred_element_type=jnp.float32)        # (D, N)
    q_ref[...] = q_t

    # --- losses (forward values; .detach()/straight-through only change gradients) --------
    # mean||q - x||^2 over (N, D) equals the mean of the per-row minimum squared distance.
    e_latent = jnp.sum(d_min) * (1.0 / (n * d))
    q_latent = e_latent
    commitment = commitment_cost * e_latent
    vq_loss = q_latent + commitment

    # perplexity of the code-assignment histogram
    avg_probs = jnp.mean(enc_t, axis=1, keepdims=True)                   # (K, 1)
    perplexity = jnp.exp(-jnp.sum(avg_probs * jnp.log(avg_probs + 1e-10)))

    # pack the scalars into one full-lane row (single unmasked store, no scalar DMAs)
    lane = jax.lax.broadcasted_iota(jnp.int32, (1, 128), 1)
    stats = (jnp.where(lane == 0, e_latent, 0.0)
             + jnp.where(lane == 1, q_latent, 0.0)
             + jnp.where(lane == 2, commitment, 0.0)
             + jnp.where(lane == 3, vq_loss, 0.0)
             + jnp.where(lane == 4, perplexity, 0.0))
    stats_ref[...] = stats.astype(jnp.float32)


# ================================ wrapper ================================

def vector_quantizer_forward(x, embedding, commitment_cost=COMMITMENT_COST):
    """Pallas forward of VectorQuantizer.

    x: (embedding_dim, time, batch) -- the layout the torch module expects
       (its first op is inputs.permute(1, 2, 0)).
    embedding: (num_embeddings, embedding_dim) codebook.
    Returns (vq_loss, quantized, perplexity, encodings, distances,
             encoding_indices, losses_dict), mirroring the torch forward.
    """
    k, d = embedding.shape
    d0, t, b = x.shape
    assert d0 == d, "first input dim must be embedding_dim"
    n = t * b

    # Zero-copy layout fusion: (D, T, B) -> (D, N).  Column n = t*B + b is exactly the
    # row torch's inputs.permute(1, 2, 0).view(-1, D) produces, so no XLA transpose.
    flat_dn = x.reshape(d, n)

    kern = functools.partial(_vq_kernel,
                             commitment_cost=float(commitment_cost),
                             num_embeddings=k)
    vmem = pltpu.MemorySpace.VMEM
    q_t, distances, encodings, idx_row, stats = pl.pallas_call(
        kern,
        out_shape=(
            jax.ShapeDtypeStruct((d, n), jnp.float32),    # quantized, (D, N) layout
            jax.ShapeDtypeStruct((n, k), jnp.float32),    # distances
            jax.ShapeDtypeStruct((n, k), jnp.float32),    # one-hot encodings
            jax.ShapeDtypeStruct((1, n), jnp.int32),      # encoding indices (lane-dense row)
            jax.ShapeDtypeStruct((1, 128), jnp.float32),  # packed scalar stats
        ),
        in_specs=[pl.BlockSpec(memory_space=vmem),
                  pl.BlockSpec(memory_space=vmem)],
        out_specs=(pl.BlockSpec(memory_space=vmem),
                   pl.BlockSpec(memory_space=vmem),
                   pl.BlockSpec(memory_space=vmem),
                   pl.BlockSpec(memory_space=vmem),
                   pl.BlockSpec(memory_space=vmem)),
    )(flat_dn, embedding)

    # straight-through estimator (inputs + (q - inputs).detach()) is the identity on
    # forward values, so `quantized` is just the selected codewords; q_t is already in
    # (D, N) layout so this reshape back to (D, T, B) is free (no transpose).
    quantized = q_t.reshape(d, t, b)
    # (1, N) -> (N, 1) has identical linear order: metadata-only reshape.
    indices = idx_row.reshape(n, 1)

    # Reproduce the torch module's (quirky) unpacking: the permuted shape is (T, B, D) and
    # it does `_, time, batch_size = input_shape`, so "time" == B and "batch_size" == D.
    # The flat data itself is time-major (N = T*B); we keep the quirk verbatim.
    _, time_, batch_size = (t, b, d)
    losses = {
        "e_latent_loss": stats[0, 0],
        "q_latent_loss": stats[0, 1],
        "commitment_loss": stats[0, 2],
        "vq_loss": stats[0, 3],
    }
    # TODO(synk): eval-mode diagnostics (encoding_distances / embedding_distances /
    # frames_vs_embedding_distances built with itertools.combinations/product Python
    # loops, and concatenated_quantized) have no clean Pallas equivalent; the module
    # returns None for them in its default training mode, so they are omitted here.
    return (stats[0, 3], quantized, stats[0, 4],
            encodings.reshape(batch_size, time_, -1),
            distances.reshape(batch_size, time_, -1),
            indices, losses)


# ================================ pure-JAX reference ================================

def vector_quantizer_ref(x, embedding, commitment_cost=COMMITMENT_COST):
    hi = jax.lax.Precision.HIGHEST
    inputs = jnp.transpose(x, (1, 2, 0))
    d = embedding.shape[1]
    flat = inputs.reshape(-1, d)
    dist = (jnp.sum(flat ** 2, axis=1, keepdims=True)
            + jnp.sum(embedding ** 2, axis=1)
            - 2.0 * jnp.dot(flat, embedding.T, precision=hi))
    idx = jnp.argmin(dist, axis=1)
    enc = jax.nn.one_hot(idx, embedding.shape[0], dtype=jnp.float32)
    q = jnp.dot(enc, embedding, precision=hi)
    e_latent = jnp.mean((q - flat) ** 2)
    vq_loss = e_latent + commitment_cost * e_latent
    avg = jnp.mean(enc, axis=0)
    perp = jnp.exp(-jnp.sum(avg * jnp.log(avg + 1e-10)))
    q_out = jnp.transpose(q.reshape(inputs.shape), (2, 0, 1))
    return vq_loss, q_out, perp, enc, dist, idx, e_latent


# ================================ main ================================

if __name__ == "__main__":
    key = jax.random.PRNGKey(0)
    kx, ke = jax.random.split(key)
    x = jax.random.normal(kx, (EMBEDDING_DIM, IN_T, IN_B), jnp.float32)
    # nn.Embedding init of the module: uniform(-1/num_embeddings, 1/num_embeddings)
    embedding = jax.random.uniform(
        ke, (NUM_EMBEDDINGS, EMBEDDING_DIM), jnp.float32,
        -1.0 / NUM_EMBEDDINGS, 1.0 / NUM_EMBEDDINGS)

    fwd = jax.jit(vector_quantizer_forward)
    vq_loss, quantized, perplexity, encodings, distances, indices, losses = fwd(x, embedding)
    jax.block_until_ready(quantized)

    (vq_loss_r, quantized_r, perplexity_r, enc_r, dist_r, idx_r,
     e_latent_r) = vector_quantizer_ref(x, embedding)

    n = IN_T * IN_B
    assert quantized.shape == x.shape

    dist_flat = distances.reshape(n, NUM_EMBEDDINGS)
    assert jnp.allclose(dist_flat, dist_r, atol=1e-2, rtol=1e-4), "distances mismatch"

    # argmin may differ on near-ties if MXU accumulation order differs; require
    # near-total index agreement plus exact codebook-row consistency.
    idx_k = indices[:, 0]
    match = jnp.mean((idx_k == idx_r).astype(jnp.float32))
    assert match >= 0.95, f"encoding index match too low: {match}"

    q_flat = jnp.transpose(quantized, (1, 2, 0)).reshape(n, EMBEDDING_DIM)
    assert jnp.allclose(q_flat, embedding[idx_k], atol=1e-4), "quantized != selected codewords"

    enc_flat = encodings.reshape(n, NUM_EMBEDDINGS)
    assert jnp.allclose(jnp.sum(enc_flat, axis=1), 1.0), "encodings are not one-hot"

    assert jnp.allclose(vq_loss, vq_loss_r, atol=5e-3, rtol=1e-3), "vq_loss mismatch"
    assert jnp.allclose(losses["e_latent_loss"], e_latent_r, atol=5e-3, rtol=1e-3), \
        "e_latent_loss mismatch"

    avg = jnp.mean(enc_flat, axis=0)
    perp_check = jnp.exp(-jnp.sum(avg * jnp.log(avg + 1e-10)))
    assert jnp.allclose(perplexity, perp_check, rtol=1e-3), "perplexity inconsistent with encodings"
    assert jnp.allclose(perplexity, perplexity_r, rtol=0.25), "perplexity mismatch"

    print("KERNEL_OK")
</pallas_src>

<mosaic_0001>
module attributes {stable_mosaic.version = 11 : i64} {
  func.func @_vq_kernel(%arg0: memref<128x128xf32, #tpu.memory_space<vmem>>, %arg1: memref<128x128xf32, #tpu.memory_space<vmem>>, %arg2: memref<128x128xf32, #tpu.memory_space<vmem>>, %arg3: memref<128x128xf32, #tpu.memory_space<vmem>>, %arg4: memref<128x128xf32, #tpu.memory_space<vmem>>, %arg5: memref<1x128xi32, #tpu.memory_space<vmem>>, %arg6: memref<1x128xf32, #tpu.memory_space<vmem>>) attributes {dimension_semantics = [], scalar_prefetch = 0 : i64, scratch_operands = 0 : i64, tpu.core_type = #tpu.core_type<tc>} {
    %c0 = arith.constant 0 : index
    %c0_0 = arith.constant 0 : index
    %0 = vector.load %arg0[%c0, %c0_0] : memref<128x128xf32, #tpu.memory_space<vmem>>, vector<128x128xf32>
    %c0_1 = arith.constant 0 : index
    %c0_2 = arith.constant 0 : index
    %1 = vector.load %arg1[%c0_1, %c0_2] : memref<128x128xf32, #tpu.memory_space<vmem>>, vector<128x128xf32>
    %2 = arith.mulf %1, %1 : vector<128x128xf32>
    %cst = arith.constant dense<0.000000e+00> : vector<128xf32>
    %3 = vector.multi_reduction <add>, %2, %cst [1] : vector<128x128xf32> to vector<128xf32>
    %4 = vector.shape_cast %3 : vector<128xf32> to vector<128x1xf32>
    %5 = arith.mulf %0, %0 : vector<128x128xf32>
    %cst_3 = arith.constant dense<0.000000e+00> : vector<128xf32>
    %6 = vector.multi_reduction <add>, %5, %cst_3 [0] : vector<128x128xf32> to vector<128xf32>
    %7 = vector.shape_cast %6 : vector<128xf32> to vector<1x128xf32>
    %cst_4 = arith.constant dense<0.000000e+00> : vector<128x128xf32>
    %8 = tpu.matmul %1, %0, %cst_4 {dimension_numbers = #tpu.dot_dimension_numbers<[1], [0], [0], [1], [0, 0, 1, 1], [], []>} : vector<128x128xf32>, vector<128x128xf32>, vector<128x128xf32> -> vector<128x128xf32>
    %9 = vector.broadcast %4 : vector<128x1xf32> to vector<128x128xf32>
    %10 = vector.broadcast %7 : vector<1x128xf32> to vector<128x128xf32>
    %11 = arith.addf %9, %10 : vector<128x128xf32>
    %cst_5 = arith.constant 2.000000e+00 : f32
    %12 = vector.broadcast %cst_5 : f32 to vector<128x128xf32>
    %13 = arith.mulf %12, %8 : vector<128x128xf32>
    %14 = arith.subf %11, %13 : vector<128x128xf32>
    %15 = tpu.transpose %14, [1, 0] : vector<128x128xf32> -> vector<128x128xf32>
    %c0_6 = arith.constant 0 : index
    %c0_7 = arith.constant 0 : index
    %16 = vector.load %arg3[%c0_6, %c0_7] : memref<128x128xf32, #tpu.memory_space<vmem>>, vector<128x128xf32>
    tpu.vector_store %arg3[%c0_6, %c0_7], %15 {strides = array<i32>} : memref<128x128xf32, #tpu.memory_space<vmem>>, vector<128x128xf32>,
    %cst_8 = arith.constant dense<0x7F800000> : vector<128xf32>
    %17 = vector.multi_reduction <minimumf>, %14, %cst_8 [0] : vector<128x128xf32> to vector<128xf32>
    %18 = vector.shape_cast %17 : vector<128xf32> to vector<1x128xf32>
    %19 = tpu.iota {dimensions = array<i32: 0>} : vector<128x128xi32>
    %20 = arith.sitofp %19 : vector<128x128xi32> to vector<128x128xf32>
    %21 = vector.broadcast %18 : vector<1x128xf32> to vector<128x128xf32>
    %22 = arith.cmpf oeq, %14, %21 : vector<128x128xf32>
    %cst_9 = arith.constant 1.280000e+02 : f32
    %23 = vector.broadcast %cst_9 : f32 to vector<128x128xf32>
    %24 = arith.select %22, %20, %23 : vector<128x128xi1>, vector<128x128xf32>
    %cst_10 = arith.constant dense<0x7F800000> : vector<128xf32>
    %25 = vector.multi_reduction <minimumf>, %24, %cst_10 [0] : vector<128x128xf32> to vector<128xf32>
    %26 = vector.shape_cast %25 : vector<128xf32> to vector<1x128xf32>
    %27 = arith.fptosi %26 : vector<1x128xf32> to vector<1x128xi32>
    %c0_11 = arith.constant 0 : index
    %c0_12 = arith.constant 0 : index
    %28 = vector.load %arg5[%c0_11, %c0_12] : memref<1x128xi32, #tpu.memory_space<vmem>>, vector<1x128xi32>
    tpu.vector_store %arg5[%c0_11, %c0_12], %27 {strides = array<i32>} : memref<1x128xi32, #tpu.memory_space<vmem>>, vector<1x128xi32>,
    %29 = vector.broadcast %26 : vector<1x128xf32> to vector<128x128xf32>
    %30 = arith.cmpf oeq, %20, %29 : vector<128x128xf32>
    %31 = arith.extui %30 : vector<128x128xi1> to vector<128x128xi32>
    %32 = arith.sitofp %31 : vector<128x128xi32> to vector<128x128xf32>
    %33 = tpu.transpose %32, [1, 0] : vector<128x128xf32> -> vector<128x128xf32>
    %c0_13 = arith.constant 0 : index
    %c0_14 = arith.constant 0 : index
    %34 = vector.load %arg4[%c0_13, %c0_14] : memref<128x128xf32, #tpu.memory_space<vmem>>, vector<128x128xf32>
    tpu.vector_store %arg4[%c0_13, %c0_14], %33 {strides = array<i32>} : memref<128x128xf32, #tpu.memory_space<vmem>>, vector<128x128xf32>,
    %cst_15 = arith.constant dense<0.000000e+00> : vector<128x128xf32>
    %35 = tpu.matmul %1, %32, %cst_15 {dimension_numbers = #tpu.dot_dimension_numbers<[0], [0], [1], [1], [0, 1, 1, 1], [], []>} : vector<128x128xf32>, vector<128x128xf32>, vector<128x128xf32> -> vector<128x128xf32>
    %c0_16 = arith.constant 0 : index
    %c0_17 = arith.constant 0 : index
    %36 = vector.load %arg2[%c0_16, %c0_17] : memref<128x128xf32, #tpu.memory_space<vmem>>, vector<128x128xf32>
    tpu.vector_store %arg2[%c0_16, %c0_17], %35 {strides = array<i32>} : memref<128x128xf32, #tpu.memory_space<vmem>>, vector<128x128xf32>,
    %37 = vector.shape_cast %18 : vector<1x128xf32> to vector<1x1x128xf32>
    %cst_18 = arith.constant dense<0.000000e+00> : vector<1xf32>
    %38 = vector.multi_reduction <add>, %37, %cst_18 [1, 2] : vector<1x1x128xf32> to vector<1xf32>
    %39 = vector.shape_cast %38 : vector<1xf32> to vector<1x1x1xf32>
    %40 = vector.extract %39[0, 0, 0] : f32 from vector<1x1x1xf32>
    %cst_19 = arith.constant 6.10351563E-5 : f32
    %41 = arith.mulf %40, %cst_19 : f32
    %cst_20 = arith.constant 2.500000e-01 : f32
    %42 = arith.mulf %cst_20, %41 : f32
    %43 = arith.addf %41, %42 : f32
    %cst_21 = arith.constant dense<0.000000e+00> : vector<128xf32>
    %44 = vector.multi_reduction <add>, %32, %cst_21 [1] : vector<128x128xf32> to vector<128xf32>
    %45 = vector.shape_cast %44 : vector<128xf32> to vector<128x1xf32>
    %cst_22 = arith.constant 1.280000e+02 : f32
    %46 = vector.broadcast %cst_22 : f32 to vector<128x1xf32>
    %47 = arith.divf %45, %46 : vector<128x1xf32>
    %cst_23 = arith.constant 1.000000e-10 : f32
    %48 = vector.broadcast %cst_23 : f32 to vector<128x1xf32>
    %49 = arith.addf %47, %48 : vector<128x1xf32>
    %50 = math.log %49 : vector<128x1xf32>
    %51 = arith.mulf %47, %50 : vector<128x1xf32>
    %52 = vector.shape_cast %51 : vector<128x1xf32> to vector<1x128x1xf32>
    %cst_24 = arith.constant dense<0.000000e+00> : vector<1xf32>
    %53 = vector.multi_reduction <add>, %52, %cst_24 [1, 2] : vector<1x128x1xf32> to vector<1xf32>
    %54 = vector.shape_cast %53 : vector<1xf32> to vector<1x1x1xf32>
    %55 = vector.extract %54[0, 0, 0] : f32 from vector<1x1x1xf32>
    %cst_25 = arith.constant 0.000000e+00 : f32
    %56 = arith.subf %cst_25, %55 : f32
    %57 = math.exp %56 : f32
    %58 = tpu.iota {dimensions = array<i32: 1>} : vector<1x128xi32>
    %c0_i32 = arith.constant 0 : i32
    %59 = vector.broadcast %c0_i32 : i32 to vector<1x128xi32>
    %60 = arith.cmpi eq, %58, %59 : vector<1x128xi32>
    %cst_26 = arith.constant 0.000000e+00 : f32
    %61 = vector.broadcast %41 : f32 to vector<1x128xf32>
    %62 = vector.broadcast %cst_26 : f32 to vector<1x128xf32>
    %63 = arith.select %60, %61, %62 : vector<1x128xi1>, vector<1x128xf32>
    %c1_i32 = arith.constant 1 : i32
    %64 = vector.broadcast %c1_i32 : i32 to vector<1x128xi32>
    %65 = arith.cmpi eq, %58, %64 : vector<1x128xi32>
    %cst_27 = arith.constant 0.000000e+00 : f32
    %66 = vector.broadcast %41 : f32 to vector<1x128xf32>
    %67 = vector.broadcast %cst_27 : f32 to vector<1x128xf32>
    %68 = arith.select %65, %66, %67 : vector<1x128xi1>, vector<1x128xf32>
    %69 = arith.addf %63, %68 : vector<1x128xf32>
    %c2_i32 = arith.constant 2 : i32
    %70 = vector.broadcast %c2_i32 : i32 to vector<1x128xi32>
    %71 = arith.cmpi eq, %58, %70 : vector<1x128xi32>
    %cst_28 = arith.constant 0.000000e+00 : f32
    %72 = vector.broadcast %42 : f32 to vector<1x128xf32>
    %73 = vector.broadcast %cst_28 : f32 to vector<1x128xf32>
    %74 = arith.select %71, %72, %73 : vector<1x128xi1>, vector<1x128xf32>
    %75 = arith.addf %69, %74 : vector<1x128xf32>
    %c3_i32 = arith.constant 3 : i32
    %76 = vector.broadcast %c3_i32 : i32 to vector<1x128xi32>
    %77 = arith.cmpi eq, %58, %76 : vector<1x128xi32>
    %cst_29 = arith.constant 0.000000e+00 : f32
    %78 = vector.broadcast %43 : f32 to vector<1x128xf32>
    %79 = vector.broadcast %cst_29 : f32 to vector<1x128xf32>
    %80 = arith.select %77, %78, %79 : vector<1x128xi1>, vector<1x128xf32>
    %81 = arith.addf %75, %80 : vector<1x128xf32>
    %c4_i32 = arith.constant 4 : i32
    %82 = vector.broadcast %c4_i32 : i32 to vector<1x128xi32>
    %83 = arith.cmpi eq, %58, %82 : vector<1x128xi32>
    %cst_30 = arith.constant 0.000000e+00 : f32
    %84 = vector.broadcast %57 : f32 to vector<1x128xf32>
    %85 = vector.broadcast %cst_30 : f32 to vector<1x128xf32>
    %86 = arith.select %83, %84, %85 : vector<1x128xi1>, vector<1x128xf32>
    %87 = arith.addf %81, %86 : vector<1x128xf32>
    %c0_31 = arith.constant 0 : index
    %c0_32 = arith.constant 0 : index
    %88 = vector.load %arg6[%c0_31, %c0_32] : memref<1x128xf32, #tpu.memory_space<vmem>>, vector<1x128xf32>
    tpu.vector_store %arg6[%c0_31, %c0_32], %87 {strides = array<i32>} : memref<1x128xf32, #tpu.memory_space<vmem>>, vector<1x128xf32>,
    return
  }
}

</mosaic_0001>

<bundles_post_ra>
// kernel: vector_quantizer_forward.1
= control target key start
LH: loop header
LB: loop body
LE: loop exit
PB: predicated region body
PF: predicated region fallthrough
CT: control target
= control target key end

     0   :  { %s2254_s0 = inlined_call_operand.vmem [shape: f32[128,128], index: 0, kind: input, shape index: {}]   ;;  %s2255_s1 = inlined_call_operand.vmem [shape: f32[128,128], index: 1, kind: input, shape index: {}]   ;;  %s2256_s2 = inlined_call_operand.vmem [shape: f32[128,128], index: 2, kind: output, shape index: {0}]   ;;  %s2257_s3 = inlined_call_operand.vmem [shape: f32[128,128], index: 3, kind: output, shape index: {1}]   ;;  %s2258_s4 = inlined_call_operand.vmem [shape: f32[128,128], index: 4, kind: output, shape index: {2}]   ;;  %s2259_s5 = inlined_call_operand.hbm [shape: s32[1,128], index: 5, kind: output, shape index: {3}]   ;;  %s2260_s6 = inlined_call_operand.vmem [shape: f32[1,128], index: 6, kind: output, shape index: {4}]  }
   0x1   :  { %v1313_v0 = vld [vmem:[%s2254_s0 + $0x78] sm:$0xff]  ;;  %v1318_v1 = vld [vmem:[%s2254_s0 + $0x70] sm:$0xff]  ;;  %v1324_v2 = vld [vmem:[%s2254_s0] sm:$0xff] }
   0x2   :  { %1093 = vmatprep.subr.mxu0 %v1313_v0  ;;  %v1330_v3 = vld [vmem:[%s2254_s0 + $0x68] sm:$0xff]  ;;  %v1340_v5 = vld [vmem:[%s2254_s0 + $0x10] sm:$0xff]  ;;  %v97_v6 = vmul.f32 %v1324_v2, %v1324_v2  ;;  %v1353_v9 = vld [vmem:[%s2254_s0 + $0x60] sm:$0xff] }
   0x3   :  { %1094 = vmatpush3.msra.mxu0 %v1313_v0  ;;  %v1335_v4 = vld [vmem:[%s2254_s0 + $0x8] sm:$0xff]  ;;  %v99_v8 = vmul.f32 %v1340_v5, %v1340_v5  ;;  %v1358_v10 = vld [vmem:[%s2254_s0 + $0x18] sm:$0xff]  ;;  %v1366_v13 = vld [vmem:[%s2255_s1] sm:$0xff] }
   0x4   :  { %1095 = vmatprep.subr.mxu0 %v1318_v1  ;;  %v98_v7 = vmul.f32 %v1335_v4, %v1335_v4  ;;  %v100_v11 = vmul.f32 %v1358_v10, %v1358_v10  ;;  %v1372_v14 = vld [vmem:[%s2254_s0 + $0x58] sm:$0xff]  ;;  %v1377_v15 = vld [vmem:[%s2254_s0 + $0x20] sm:$0xff]  ;;  %1125 = vmatprep.mubr.f32.mxu0 %v1366_v13  ;;  %v1383_v16 = vld [vmem:[%s2255_s1 + $0x10] sm:$0xff]  ;;  %v49_v17 = vmul.f32 %v1366_v13, %v1366_v13 }
   0x5   :  { %1096 = vmatpush3.msra.mxu0 %v1318_v1  ;;  %v101_v18 = vmul.f32 %v1377_v15, %v1377_v15  ;;  %v1393_v20 = vld [vmem:[%s2255_s1 + $0x8] sm:$0xff]  ;;  %v51_v21 = vmul.f32 %v1383_v16, %v1383_v16  ;;  %v27_v23 = vld [vmem:[%s2254_s0 + $0x50] sm:$0xff]  ;;  %v1407_v24 = vld [vmem:[%s2255_s1 + $0x18] sm:$0xff] }
   0x6   :  { %1097 = vmatprep.subr.mxu0 %v1330_v3  ;;  %v113_v12 = vadd.f32 %v98_v7, %v97_v6  ;;  %v22_v22 = vld [vmem:[%s2254_s0 + $0x28] sm:$0xff]  ;;  %65 = vadd.xlane.f32.xlu0 %v49_v17  ;;  %v50_v25 = vmul.f32 %v1393_v20, %v1393_v20  ;;  %v52_v28 = vmul.f32 %v1407_v24, %v1407_v24  ;;  %v23_v29 = vld [vmem:[%s2254_s0 + $0x30] sm:$0xff] }
   0x7   :  { %1098 = vmatpush3.msra.mxu0 %v1330_v3  ;;  %v102_v26 = vmul.f32 %v22_v22, %v22_v22  ;;  %69 = vadd.xlane.f32.xlu1 %v51_v21  ;;  %v26_v30 = vld [vmem:[%s2254_s0 + $0x48] sm:$0xff] }
   0x8   :  { %1099 = vmatprep.subr.mxu0 %v1353_v9  ;;  %v114_v19 = vadd.f32 %v113_v12, %v99_v8 }
   0x9   :  { %1100 = vmatpush3.msra.mxu0 %v1353_v9 }
   0xa   :  { %1101 = vmatprep.subr.mxu0 %v1372_v14  ;;  %v115_v27 = vadd.f32 %v114_v19, %v100_v11 }
   0xb   :  { %1102 = vmatpush3.msra.mxu0 %v1372_v14 }
   0xc   :  { %12 = vsyncpa [#allocation3], 0  ;;  %v103_v31 = vmul.f32 %v23_v29, %v23_v29  ;;  %v116_v32 = vadd.f32 %v115_v27, %v101_v18  ;;  %1103 = vmatprep.subr.mxu0 %v27_v23  ;;  %v1424_v33 = vld [vmem:[%s2255_s1 + $0x20] sm:$0xff]  ;;  %v24_v34 = vld [vmem:[%s2254_s0 + $0x38] sm:$0xff]  ;;  %67 = vadd.xlane.f32.xlu0 %v50_v25  ;;  %v106_v46 = vmul.f32 %v26_v30, %v26_v30  ;;  %s1274_s15 = smov [#allocation2]  }
   0xd   :  { %v25_v35 = vld [vmem:[%s2254_s0 + $0x40] sm:$0xff]  ;;  %1104 = vmatpush3.msra.mxu0 %v27_v23  ;;  %v1435_v36 = vld [vmem:[%s2255_s1 + $0x28] sm:$0xff]  ;;  %v53_v37 = vmul.f32 %v1424_v33, %v1424_v33  ;;  %v104_v38 = vmul.f32 %v24_v34, %v24_v34  ;;  %71 = vadd.xlane.f32.xlu1 %v52_v28  ;;  %v1444_v43 = vld [vmem:[%s2255_s1 + $0x30] sm:$0xff]  ;;  %v107_v49 = vmul.f32 %v27_v23, %v27_v23  ;;  %s979_s16 = sshll.u32 %s1274_s15, 4  ;;  %s980_s16 = int_to_ptr.vmem [resolvable:$true] %s979_s16 }
   0xe   :  { %v117_v39 = vadd.f32 %v116_v32, %v102_v26  ;;  %1105 = vmatprep.subr.mxu0 %v26_v30  ;;  %v54_v40 = vmul.f32 %v1435_v36, %v1435_v36  ;;  %v105_v41 = vmul.f32 %v25_v35, %v25_v35  ;;  %v1449_v44 = vld [vmem:[%s2255_s1 + $0x38] sm:$0xff]  ;;  %v55_v45 = vmul.f32 %v1444_v43, %v1444_v43  ;;  %v1458_v51 = vld [vmem:[%s2255_s1 + $0x40] sm:$0xff]  ;;  %v1463_v52 = vld [vmem:[%s2255_s1 + $0x48] sm:$0xff]  ;;  %s1250_s0 = scalar_lea.vmem %s980_s16, 16  ;;  %s1254_s17 = scalar_lea.vmem %s980_s16, 32 }
   0xf   :  { %1106 = vmatpush3.msra.mxu0 %v26_v30  ;;  %v56_v48 = vmul.f32 %v1449_v44, %v1449_v44  ;;  %v57_v53 = vmul.f32 %v1458_v51, %v1458_v51  ;;  %v108_v54 = vmul.f32 %v1372_v14, %v1372_v14  ;;  %v58_v56 = vmul.f32 %v1463_v52, %v1463_v52  ;;  %v1477_v59 = vld [vmem:[%s2255_s1 + $0x50] sm:$0xff]  ;;  %v1483_v60 = vld [vmem:[%s2255_s1 + $0x58] sm:$0xff]  ;;  %p1251_p0 = scmp.ne.s32.totalorder %s980_s16, %s1250_s0  ;;  %p1255_p1 = scmp.lt.s32.totalorder %s980_s16, %s980_s16 }
  0x10   :  { %v118_v42 = vadd.f32 %v117_v39, %v103_v31  ;;  %1107 = vmatprep.subr.mxu0 %v25_v35  ;;  %73 = vadd.xlane.f32.xlu0 %v53_v37  ;;  %v109_v57 = vmul.f32 %v1353_v9, %v1353_v9  ;;  %v59_v61 = vmul.f32 %v1477_v59, %v1477_v59  ;;  %v1499_v9 = vld [vmem:[%s2255_s1 + $0x60] sm:$0xff]  ;;  %v1519_v14 = vld [vmem:[%s2255_s1 + $0x70] sm:$0xff]  ;;  %p1256_p2 = scmp.lt.s32.totalorder %s1254_s17, %s1250_s0 }
  0x11   :  { %1108 = vmatpush3.msra.mxu0 %v25_v35  ;;  %75 = vadd.xlane.f32.xlu1 %v54_v40  ;;  %v110_v62 = vmul.f32 %v1330_v3, %v1330_v3  ;;  %v60_v6 = vmul.f32 %v1483_v60, %v1483_v60  ;;  %v111_v7 = vmul.f32 %v1318_v1, %v1318_v1  ;;  %v1505_v3 = vld [vmem:[%s2255_s1 + $0x68] sm:$0xff] }
  0x12   :  { %v119_v47 = vadd.f32 %v118_v42, %v104_v38  ;;  %1109 = vmatprep.subr.mxu0 %v24_v34  ;;  %v112_v1 = vmul.f32 %v1313_v0, %v1313_v0  ;;  %v62_v12 = vmul.f32 %v1505_v3, %v1505_v3  ;;  %v1525_v0 = vld [vmem:[%s2255_s1 + $0x78] sm:$0xff]  ;;  %p1257_p3 = por %p1256_p2, %p1255_p1 }
  0x13   :  { %1110 = vmatpush3.msra.mxu0 %v24_v34  ;;  %v64_v17 = vmul.f32 %v1525_v0, %v1525_v0 }
  0x14   :  { %v120_v50 = vadd.f32 %v119_v47, %v105_v41  ;;  %1111 = vmatprep.subr.mxu0 %v23_v29  ;;  %77 = vadd.xlane.f32.xlu0 %v55_v45  ;;  %p1258_p4 = pnand %p1257_p3, %p1251_p0 }
  0x15   :  { %1112 = vmatpush3.msra.mxu0 %v23_v29  ;;  %79 = vadd.xlane.f32.xlu1 %v56_v48 }
  0x16   :  { %v121_v55 = vadd.f32 %v120_v50, %v106_v46  ;;  %1113 = vmatprep.subr.mxu0 %v22_v22 }
  0x17   :  { %1114 = vmatpush3.msra.mxu0 %v22_v22 }
  0x18   :  { %v122_v58 = vadd.f32 %v121_v55, %v107_v49  ;;  %1115 = vmatprep.subr.mxu0 %v1377_v15  ;;  %81 = vadd.xlane.f32.xlu0 %v57_v53 }
  0x19   :  { %1116 = vmatpush3.msra.mxu0 %v1377_v15  ;;  %83 = vadd.xlane.f32.xlu1 %v58_v56  ;;  %v63_v15 = vmul.f32 %v1519_v14, %v1519_v14 }
  0x1a   :  { %v123_v63 = vadd.f32 %v122_v58, %v108_v54  ;;  %1117 = vmatprep.subr.mxu0 %v1358_v10 }
  0x1b   :  { %1118 = vmatpush3.msra.mxu0 %v1358_v10  ;;  %v61_v10 = vmul.f32 %v1499_v9, %v1499_v9 }
  0x1c   :  { %v124_v8 = vadd.f32 %v123_v63, %v109_v57  ;;  %1119 = vmatprep.subr.mxu0 %v1340_v5  ;;  %85 = vadd.xlane.f32.xlu0 %v59_v61 }
  0x1d   :  { %1120 = vmatpush3.msra.mxu0 %v1340_v5  ;;  %87 = vadd.xlane.f32.xlu1 %v60_v6 }
  0x1e   :  { %v125_v11 = vadd.f32 %v124_v8, %v110_v62  ;;  %1121 = vmatprep.subr.mxu0 %v1335_v4 }
  0x1f   :  { %1122 = vmatpush3.msra.mxu0 %v1335_v4 }
  0x20   :  { %v126_v5 = vadd.f32 %v125_v11, %v111_v7  ;;  %1123 = vmatprep.subr.mxu0 %v1324_v2  ;;  %89 = vadd.xlane.f32.xlu0 %v61_v10 }
  0x21   :  { %1124 = vmatpush3.msra.mxu0 %v1324_v2  ;;  %91 = vadd.xlane.f32.xlu1 %v62_v12 }
  0x22   :  { %v127_v4 = vadd.f32 %v126_v5, %v112_v1  ;;  %1126 = vmatmul.mubr.f32.vlgmr.msra.gmra.mxu0 %v1393_v20 }
  0x23   :  { %1128 = vmatprep.mubr.f32.mxu0 %v1383_v16 }
  0x24   :  { %93 = vadd.xlane.f32.xlu0 %v63_v15  ;;  %v128_v25 = vrot.slane %v127_v4, 4 }
  0x25   :  { %95 = vadd.xlane.f32.xlu1 %v64_v17 }
  0x26   :  { %1129 = vmatmul.mubr.f32.gmra.mxu0 %v1407_v24  ;;  %v129_v28 = vadd.f32 %v128_v25, %v127_v4 }
  0x27   :  { %1131 = vmatprep.mubr.f32.mxu0 %v1424_v33 }
  0x28   :  { %v130_v31 = vrot.slane %v129_v28, 2 }
  0x2a   :  { %1132 = vmatmul.mubr.f32.gmra.mxu0 %v1435_v36  ;;  %v131_v38 = vadd.f32 %v130_v31, %v129_v28 }
  0x2b   :  { %1134 = vmatprep.mubr.f32.mxu0 %v1444_v43 }
  0x2c   :  { %v132_v45 = vrot.slane %v131_v38, 1 }
  0x2e   :  { %1135 = vmatmul.mubr.f32.gmra.mxu0 %v1449_v44  ;;  %v133_v48 = vadd.f32 %v132_v45, %v131_v38 }
  0x2f   :  { %1137 = vmatprep.mubr.f32.mxu0 %v1458_v51 }
  0x32   :  { %1138 = vmatmul.mubr.f32.gmra.mxu0 %v1463_v52 }
  0x33   :  { %1140 = vmatprep.mubr.f32.mxu0 %v1477_v59 }
  0x36   :  { %1141 = vmatmul.mubr.f32.gmra.mxu0 %v1483_v60 }
  0x37   :  { %1143 = vmatprep.mubr.f32.mxu0 %v1499_v9 }
  0x3a   :  { %1144 = vmatmul.mubr.f32.gmra.mxu0 %v1505_v3 }
  0x3b   :  { %1146 = vmatprep.mubr.f32.mxu0 %v1519_v14 }
  0x3e   :  { %1147 = vmatmul.mubr.f32.gmra.mxu0 %v1525_v0 }
  0x8f   :  { %v66_v18 = vpop.xlane.xlu0 %65 }
  0x90   :  { %v70_v2 = vpop.xlane.xlu1 %69  ;;  %v279_v54 = vadd.f32 %v133_v48, %v66_v18 }
  0x91   :  { %v281_v56 = vadd.f32 %v133_v48, %v70_v2 }
  0x95   :  { %v68_v21 = vpop.xlane.xlu0 %67 }
  0x96   :  { %v72_v19 = vpop.xlane.xlu1 %71  ;;  %v280_v57 = vadd.f32 %v133_v48, %v68_v21 }
  0x97   :  { %v282_v58 = vadd.f32 %v133_v48, %v72_v19 }
  0x99   :  { %v74_v22 = vpop.xlane.xlu0 %73 }
  0x9a   :  { %v76_v23 = vpop.xlane.xlu1 %75  ;;  %v283_v61 = vadd.f32 %v133_v48, %v74_v22 }
  0x9b   :  { %v284_v62 = vadd.f32 %v133_v48, %v76_v23 }
  0x9d   :  { %v78_v26 = vpop.xlane.xlu0 %77 }
  0x9e   :  { %v80_v27 = vpop.xlane.xlu1 %79  ;;  %v285_v7 = vadd.f32 %v133_v48, %v78_v26 }
  0x9f   :  { %v286_v6 = vadd.f32 %v133_v48, %v80_v27 }
  0xa1   :  { %v82_v32 = vpop.xlane.xlu0 %81 }
  0xa2   :  { %v84_v35 = vpop.xlane.xlu1 %83  ;;  %v287_v1 = vadd.f32 %v133_v48, %v82_v32 }
  0xa3   :  { %v288_v10 = vadd.f32 %v133_v48, %v84_v35 }
  0xa5   :  { %v86_v40 = vpop.xlane.xlu0 %85 }
  0xa6   :  { %v88_v42 = vpop.xlane.xlu1 %87  ;;  %v289_v12 = vadd.f32 %v133_v48, %v86_v40 }
  0xa7   :  { %v290_v11 = vadd.f32 %v133_v48, %v88_v42 }
  0xa9   :  { %v90_v49 = vpop.xlane.xlu0 %89 }
  0xaa   :  { %v92_v53 = vpop.xlane.xlu1 %91  ;;  %v291_v22 = vadd.f32 %v133_v48, %v90_v49 }
  0xab   :  { %v292_v19 = vadd.f32 %v133_v48, %v92_v53 }
  0xad   :  { %v94_v5 = vpop.xlane.xlu0 %93 }
  0xae   :  { %v96_v28 = vpop.xlane.xlu1 %95 }
  0xaf   :  { %v294_v40 = vadd.f32 %v133_v48, %v96_v28  ;;  %v2261_v28 = vlaneseq }
  0xe2   :  { %v1127_v29 = vpop.f32.mrf.mxu0 }
  0xe3   :  { %v296_v2 = vmul.f32 2.0, %v1127_v29 }
  0xe4   :  { %v200_v30 = vpop.f32.mrf.mxu0 }
  0xe5   :  { %v295_v15 = vmul.f32 2.0, %v200_v30 }
  0xe6   :  { %v1130_v34 = vpop.f32.mrf.mxu0 }
  0xe7   :  { %v298_v23 = vmul.f32 2.0, %v1130_v34  ;;  %v1548_v30 = vsub.f32 %v279_v54, %v295_v15 }
  0xe8   :  { %v210_v37 = vpop.f32.mrf.mxu0 }
  0xe9   :  { %v297_v31 = vmul.f32 2.0, %v210_v37  ;;  %v1560_v49 = vsub.f32 %v282_v58, %v298_v23 }
  0xea   :  { %v1133_v39 = vpop.f32.mrf.mxu0 }
  0xeb   :  { %v300_v4 = vmul.f32 2.0, %v1133_v39 }
  0xec   :  { %v220_v41 = vpop.f32.mrf.mxu0 }
  0xed   :  { %v299_v63 = vmul.f32 2.0, %v220_v41  ;;  %v293_v41 = vadd.f32 %v133_v48, %v94_v5  ;;  %v1550_v39 = vsub.f32 %v284_v62, %v300_v4 }
  0xee   :  { %v1136_v46 = vpop.f32.mrf.mxu0 }
  0xef   :  { %v302_v17 = vmul.f32 2.0, %v1136_v46  ;;  %v1546_v27 = vsub.f32 %v283_v61, %v299_v63  ;;  %2284 = vst [vmem:[#allocation6_spill] sm:$0xff] %v1550_v39  ;;  %v1556_v46 = vsub.f32 %v280_v57, %v296_v2 }
  0xf0   :  { %v230_v47 = vpop.f32.mrf.mxu0 }
  0xf1   :  { %v301_v25 = vmul.f32 2.0, %v230_v47  ;;  %2283 = vst [vmem:[#allocation5_spill] sm:$0xff] %v1546_v27  ;;  %v1552_v42 = vsub.f32 %v286_v6, %v302_v17  ;;  %v375_v48 = vmin.f32 %v1548_v30, %v1546_v27  ;;  %v376_v63 = vmin.f32 %v1556_v46, %v1550_v39 }
  0xf2   :  { %v1139_v50 = vpop.f32.mrf.mxu0 }
  0xf3   :  { %v304_v26 = vmul.f32 2.0, %v1139_v50  ;;  %2285 = vst [vmem:[#allocation7_spill] sm:$0xff] %v1552_v42  ;;  %v1554_v29 = vsub.f32 %v285_v7, %v301_v25  ;;  %v1562_v50 = vsub.f32 %v281_v56, %v297_v31  ;;  %v378_v56 = vmin.f32 %v1560_v49, %v1552_v42 }
  0xf4   :  { %v240_v55 = vpop.f32.mrf.mxu0 }
  0xf5   :  { %v303_v21 = vmul.f32 2.0, %v240_v55  ;;  %2286 = vst [vmem:[#allocation8_spill] sm:$0xff] %v1554_v29  ;;  %v1566_v53 = vsub.f32 %v288_v10, %v304_v26  ;;  %v377_v58 = vmin.f32 %v1562_v50, %v1554_v29 }
  0xf6   :  { %v1142_v8 = vpop.f32.mrf.mxu0 }
  0xf7   :  { %v306_v32 = vmul.f32 2.0, %v1142_v8  ;;  %v1558_v34 = vsub.f32 %v287_v1, %v303_v21  ;;  %2288 = vst [vmem:[#allocation10_spill] sm:$0xff] %v1566_v53 }
  0xf8   :  { %v250_v18 = vpop.f32.mrf.mxu0 }
  0xf9   :  { %v305_v38 = vmul.f32 2.0, %v250_v18  ;;  %2287 = vst [vmem:[#allocation9_spill] sm:$0xff] %v1558_v34  ;;  %v1568_v55 = vsub.f32 %v290_v11, %v306_v32  ;;  %v379_v7 = vmin.f32 %v375_v48, %v1558_v34  ;;  %v380_v11 = vmin.f32 %v376_v63, %v1566_v53 }
  0xfa   :  { %v1145_v35 = vpop.f32.mrf.mxu0 }
  0xfb   :  { %v308_v37 = vmul.f32 2.0, %v1145_v35  ;;  %2289 = vst [vmem:[#allocation11_spill] sm:$0xff] %v1568_v55  ;;  %v1570_v61 = vsub.f32 %v289_v12, %v305_v38  ;;  %v382_v12 = vmin.f32 %v378_v56, %v1568_v55 }
  0xfc   :  { %v260_v45 = vpop.f32.mrf.mxu0 }
  0xfd   :  { %v307_v47 = vmul.f32 2.0, %v260_v45  ;;  %2290 = vst [vmem:[#allocation12_spill] sm:$0xff] %v1570_v61  ;;  %v1581_v8 = vsub.f32 %v292_v19, %v308_v37  ;;  %v381_v5 = vmin.f32 %v377_v58, %v1570_v61 }
  0xfe   :  { %v1148_v54 = vpop.f32.mrf.mxu0 }
  0xff   :  { %v1572_v57 = vsub.f32 %v291_v22, %v307_v47  ;;  %v310_v62 = vmul.f32 2.0, %v1148_v54  ;;  %2292 = vst [vmem:[#allocation14_spill] sm:$0xff] %v1581_v8  ;;  %v384_v17 = vmin.f32 %v380_v11, %v1581_v8  ;;  %v1595_v22 = vshrl.u32 %v2261_v28, 7 }
 0x100   :  { %v270_v6 = vpop.f32.mrf.mxu0 }
 0x101   :  { %2291 = vst [vmem:[#allocation13_spill] sm:$0xff] %v1572_v57  ;;  %v1583_v10 = vsub.f32 %v294_v40, %v310_v62  ;;  %v309_v1 = vmul.f32 2.0, %v270_v6  ;;  %v383_v15 = vmin.f32 %v379_v7, %v1572_v57  ;;  %v1598_v26 = vadd.s32 16, %v1595_v22 }
 0x102   :  { %v1601_v32 = vadd.s32 48, %v1595_v22  ;;  %v1604_v38 = vadd.s32 80, %v1595_v22  ;;  %v1607_v40 = vadd.s32 112, %v1595_v22  ;;  %v1611_v37 = vadd.s32 8, %v1595_v22 }
 0x103   :  { %2293 = vst [vmem:[#allocation15_spill] sm:$0xff] %v1583_v10  ;;  %v1589_v4 = vsub.f32 %v293_v41, %v309_v1  ;;  %v386_v25 = vmin.f32 %v382_v12, %v1583_v10  ;;  %v387_v2 = vmin.f32 %v383_v15, %v384_v17  ;;  %v2263_v45 = vcvt.s32.f32 %v1598_v26 }
 0x104   :  { %v1614_v47 = vadd.s32 24, %v1595_v22  ;;  %v1617_v48 = vadd.s32 32, %v1595_v22  ;;  %v2262_v62 = vcvt.s32.f32 %v1601_v32  ;;  %v2264_v63 = vcvt.s32.f32 %v1604_v38 }
 0x105   :  { %2294 = vst [vmem:[#allocation16_spill] sm:$0xff] %v1589_v4  ;;  %v385_v18 = vmin.f32 %v381_v5, %v1589_v4  ;;  %v1622_v56 = vadd.s32 40, %v1595_v22  ;;  %v1626_v6 = vadd.s32 56, %v1595_v22  ;;  %v1629_v7 = vadd.s32 64, %v1595_v22 }
 0x106   :  { %v1632_v1 = vadd.s32 72, %v1595_v22  ;;  %v1637_v12 = vadd.s32 88, %v1595_v22  ;;  %v1640_v5 = vadd.s32 96, %v1595_v22  ;;  %v1643_v15 = vadd.s32 104, %v1595_v22 }
 0x107   :  { %v388_v21 = vmin.f32 %v385_v18, %v386_v25  ;;  %v1646_v17 = vadd.s32 120, %v1595_v22  ;;  %v2265_v25 = vcvt.s32.f32 %v1595_v22  ;;  %v2269_v18 = vcvt.s32.f32 %v1611_v37 }
 0x109   :  { %v389_v19 = vmin.f32 %v387_v2, %v388_v21  ;;  %v2268_v2 = vcvt.s32.f32 %v1614_v47  ;;  %v2266_v21 = vcvt.s32.f32 %v1617_v48 }
 0x10b   :  { %v390_v23 = vrot.slane %v389_v19, 4 }
 0x10d   :  { %v391_v31 = vmin.f32 %v389_v19, %v390_v23  ;;  %v2267_v19 = vcvt.s32.f32 %v1622_v56 }
 0x10f   :  { %v392_v35 = vrot.slane %v391_v31, 2 }
 0x111   :  { %v393_v41 = vmin.f32 %v391_v31, %v392_v35  ;;  %v2270_v35 = vcvt.s32.f32 %v1626_v6 }
 0x113   :  { %v394_v54 = vrot.slane %v393_v41, 1 }
 0x115   :  { %v1634_v11 = vmin.f32 %v393_v41, %v394_v54 }
 0x117   :  { %vm431_vm0 = vcmp.eq.f32.partialorder %v1562_v50, %v1634_v11  ;;  %vm435_vm1 = vcmp.eq.f32.partialorder %v1554_v29, %v1634_v11  ;;  %vm439_vm2 = vcmp.eq.f32.partialorder %v1570_v61, %v1634_v11  ;;  %vm429_vm3 = vcmp.eq.f32.partialorder %v1548_v30, %v1634_v11 }
 0x118   :  { %v447_v23 = vsel %vm431_vm0, %v2263_v45, 128.0  ;;  %v451_v31 = vsel %vm435_vm1, %v2262_v62, 128.0  ;;  %vm430_vm4 = vcmp.eq.f32.partialorder %v1556_v46, %v1634_v11  ;;  %vm432_vm5 = vcmp.eq.f32.partialorder %v1560_v49, %v1634_v11 }
 0x119   :  { %v463_v54 = vmin.f32 %v447_v23, %v451_v31  ;;  %vm433_vm6 = vcmp.eq.f32.partialorder %v1546_v27, %v1634_v11  ;;  %vm434_vm7 = vcmp.eq.f32.partialorder %v1550_v39, %v1634_v11  ;;  %v426_v31 = vcvt.s32.f32 %v1643_v15 }
 0x11a   :  { %vm436_vm8 = vcmp.eq.f32.partialorder %v1552_v42, %v1634_v11  ;;  %vm443_vm9 = vcmp.eq.f32.partialorder %v1589_v4, %v1634_v11  ;;  %v455_v45 = vsel %vm439_vm2, %v2264_v63, 128.0  ;;  %vm437_vm10 = vcmp.eq.f32.partialorder %v1558_v34, %v1634_v11 }
 0x11b   :  { %v445_v28 = vsel %vm429_vm3, %v2265_v25, 128.0  ;;  %v446_v23 = vsel %vm430_vm4, %v2269_v18, 128.0  ;;  %v448_v15 = vsel %vm432_vm5, %v2268_v2, 128.0  ;;  %v449_v62 = vsel %vm433_vm6, %v2266_v21, 128.0 }
 0x11c   :  { %v450_v58 = vsel %vm434_vm7, %v2267_v19, 128.0  ;;  %v467_v41 = vmin.f32 %v463_v54, %v455_v45  ;;  %vm438_vm11 = vcmp.eq.f32.partialorder %v1566_v53, %v1634_v11  ;;  %vm440_vm12 = vcmp.eq.f32.partialorder %v1568_v55, %v1634_v11 }
 0x11d   :  { %v452_v63 = vsel %vm436_vm8, %v2270_v35, 128.0  ;;  %v428_v25 = vcvt.s32.f32 %v1646_v17  ;;  %vm441_vm13 = vcmp.eq.f32.partialorder %v1572_v57, %v1634_v11  ;;  %vm442_vm14 = vcmp.eq.f32.partialorder %v1581_v8, %v1634_v11 }
 0x11e   :  { %v461_v21 = vmin.f32 %v445_v28, %v449_v62  ;;  %vm444_vm15 = vcmp.eq.f32.partialorder %v1583_v10, %v1634_v11  ;;  %v2295_v45 = vcvt.s32.f32 %v1629_v7  ;;  %v462_v19 = vmin.f32 %v446_v23, %v450_v58 }
 0x11f   :  { %v464_v2 = vmin.f32 %v448_v15, %v452_v63  ;;  %v2296_v18 = vcvt.s32.f32 %v1607_v40  ;;  %v2297_v35 = vcvt.s32.f32 %v1632_v1  ;;  %v2298_v8 = vcvt.s32.f32 %v1637_v12 }
 0x120   :  { %v453_v54 = vsel %vm437_vm10, %v2295_v45, 128.0  ;;  %v2299_v10 = vcvt.s32.f32 %v1640_v5  ;;  %v458_v63 = vsel %vm442_vm14, %v426_v31, 128.0  ;;  %v460_v23 = vsel %vm444_vm15, %v428_v25, 128.0 }
 0x121   :  { %v459_v17 = vsel %vm443_vm9, %v2296_v18, 128.0  ;;  %v454_v57 = vsel %vm438_vm11, %v2297_v35, 128.0  ;;  %v456_v28 = vsel %vm440_vm12, %v2298_v8, 128.0  ;;  %v465_v62 = vmin.f32 %v461_v21, %v453_v54 }
 0x122   :  { %v471_v55 = vmin.f32 %v467_v41, %v459_v17  ;;  %v457_v61 = vsel %vm441_vm13, %v2299_v10, 128.0  ;;  %v466_v45 = vmin.f32 %v462_v19, %v454_v57  ;;  %v468_v58 = vmin.f32 %v464_v2, %v456_v28 }
 0x123   :  { %v469_v15 = vmin.f32 %v465_v62, %v457_v61  ;;  %v2302_v57 = vcvt.s32.f32 %v1611_v37  ;;  %v2314_v37 = vcvt.s32.f32 %v1598_v26  ;;  %v2319_v2 = vcvt.s32.f32 %v1640_v5 }
 0x124   :  { %v470_v53 = vmin.f32 %v466_v45, %v458_v63  ;;  %v472_v34 = vmin.f32 %v468_v58, %v460_v23  ;;  %v2325_v17 = vcvt.s32.f32 %v1617_v48  ;;  %v2331_v45 = vcvt.s32.f32 %v1604_v38 }
 0x125   :  { %v2334_v63 = vcvt.s32.f32 %v1626_v6  ;;  %v2340_v6 = vcvt.s32.f32 %v1632_v1  ;;  %v2341_v1 = vcvt.s32.f32 %v1629_v7 }
 0x126   :  { %v473_v4 = vmin.f32 %v469_v15, %v470_v53  ;;  %v474_v18 = vmin.f32 %v471_v55, %v472_v34  ;;  %v2305_v53 = vcvt.s32.f32 %v1595_v22  ;;  %v2308_v55 = vcvt.s32.f32 %v1607_v40 }
 0x128   :  { %v475_v42 = vmin.f32 %v473_v4, %v474_v18  ;;  %v2311_v4 = vcvt.s32.f32 %v1614_v47  ;;  %v2337_v18 = vcvt.s32.f32 %v1601_v32 }
 0x12a   :  { %v476_v29 = vrot.slane %v475_v42, 4 }
 0x12c   :  { %v477_v35 = vmin.f32 %v475_v42, %v476_v29  ;;  %v1272_v42 = vmov 1.0  }
 0x12e   :  { %v478_v39 = vrot.slane %v477_v35, 2 }
 0x130   :  { %v479_v27 = vmin.f32 %v477_v35, %v478_v39 }
 0x132   :  { %v480_v8 = vrot.slane %v479_v27, 1 }
 0x134   :  { %v481_v21 = vmin.f32 %v479_v27, %v480_v8  ;;  %v1273_v27 = vmov 0.0  }
 0x136   :  { %vm1723_vm0 = vcmp.eq.f32.partialorder %v428_v25, %v481_v21  ;;  %vm1729_vm1 = vcmp.eq.f32.partialorder %v2302_v57, %v481_v21  ;;  %vm1735_vm2 = vcmp.eq.f32.partialorder %v2305_v53, %v481_v21  ;;  %vm1758_vm3 = vcmp.eq.f32.partialorder %v2308_v55, %v481_v21 }
 0x137   :  { %1149 = vmatprep.subr.msk.mxu1 %vm1723_vm0, %v1272_v42  ;;  %v1745_v39 = vsel %vm1729_vm1, 1.0, %v1273_v27  ;;  %v1750_v29 = vsel %vm1735_vm2, 1.0, %v1273_v27  ;;  %vm1764_vm4 = vcmp.eq.f32.partialorder %v2311_v4, %v481_v21  ;;  %vm1774_vm5 = vcmp.eq.f32.partialorder %v2314_v37, %v481_v21 }
 0x138   :  { %1150 = vmatpush3.msk.msra.mxu1 %vm1723_vm0, %v1272_v42  ;;  %789 = vadd.xlane.f32.xlu1 %v1745_v39  ;;  %vm1781_vm6 = vcmp.eq.f32.partialorder %v426_v31, %v481_v21  ;;  %v1791_v26 = vsel %vm1764_vm4, 1.0, %v1273_v27  ;;  %v1800_v25 = vsel %vm1774_vm5, 1.0, %v1273_v27  ;;  %vm1804_vm7 = vcmp.eq.f32.partialorder %v2319_v2, %v481_v21 }
 0x139   :  { %787 = vadd.xlane.f32.xlu0 %v1750_v29  ;;  %1151 = vmatprep.subr.msk.mxu1 %vm1758_vm3, %v1272_v42  ;;  %v2322_v31 = vcvt.s32.f32 %v1622_v56  ;;  %vm1820_vm9 = vcmp.eq.f32.partialorder %v2325_v17, %v481_v21  ;;  %v2328_v56 = vcvt.s32.f32 %v1637_v12  ;;  %v1205_v62 = vtrunc.f32 %v481_v21 }
 0x13a   :  { %1152 = vmatpush3.msk.msra.mxu1 %vm1758_vm3, %v1272_v42  ;;  %v1848_v12 = vsel %vm1820_vm9, 1.0, %v1273_v27  ;;  %vm1852_vm11 = vcmp.eq.f32.partialorder %v2331_v45, %v481_v21  ;;  %vm1858_vm12 = vcmp.eq.f32.partialorder %v2334_v63, %v481_v21  ;;  %vm1868_vm13 = vcmp.eq.f32.partialorder %v2337_v18, %v481_v21 }
 0x13b   :  { %1153 = vmatprep.subr.msk.mxu1 %vm1781_vm6, %v1272_v42  ;;  %vm1810_vm8 = vcmp.eq.f32.partialorder %v2322_v31, %v481_v21  ;;  %vm1829_vm10 = vcmp.eq.f32.partialorder %v2328_v56, %v481_v21  ;;  %v1206_v15 = vcvt.f32.s32 %v1205_v62  ;;  %vm493_vm14 = vcmp.eq.f32.partialorder %v2340_v6, %v481_v21 }
 0x13c   :  { %1154 = vmatpush3.msk.msra.mxu1 %vm1781_vm6, %v1272_v42  ;;  %793 = vadd.xlane.f32.xlu1 %v1791_v26  ;;  %v1839_v48 = vsel %vm1810_vm8, 1.0, %v1273_v27  ;;  %v1881_v35 = vsel %vm1858_vm12, 1.0, %v1273_v27  ;;  %v1888_v32 = vsel %vm1868_vm13, 1.0, %v1273_v27  ;;  %vm492_vm15 = vcmp.eq.f32.partialorder %v2341_v1, %v481_v21 }
 0x13d   :  { %791 = vadd.xlane.f32.xlu0 %v1800_v25  ;;  %1155 = vmatprep.subr.msk.mxu1 %vm1804_vm7, %v1272_v42  ;;  %483 = vst [vmem:[#allocation2] sm:$0x1] %v1206_v15  ;;  %v1899_v8 = vsel %vm493_vm14, 1.0, %v1273_v27  ;;  %v1906_v7 = vsel %vm492_vm15, 1.0, %v1273_v27  ;;  %v1921_v21 = vsel %vm1829_vm10, 1.0, %v1273_v27  ;;  %v1930_v57 = vsel %vm1852_vm11, 1.0, %v1273_v27 }
 0x13e   :  { %1156 = vmatpush3.msk.msra.mxu1 %vm1804_vm7, %v1272_v42  ;;  %v1945_v53 = vsel %vm1781_vm6, 1.0, %v1273_v27  ;;  %v1954_v55 = vsel %vm1804_vm7, 1.0, %v1273_v27  ;;  %v1969_v4 = vsel %vm1723_vm0, 1.0, %v1273_v27  ;;  %v1978_v22 = vsel %vm1758_vm3, 1.0, %v1273_v27 }
 0x13f   :  { %1157 = vmatprep.subr.msk.mxu1 %vm1829_vm10, %v1272_v42  ;;  %vm900_vm0 = vcmask 7168  }
 0x140   :  { %1158 = vmatpush3.msk.msra.mxu1 %vm1829_vm10, %v1272_v42  ;;  %797 = vadd.xlane.f32.xlu1 %v1839_v48 }
 0x141   :  { %795 = vadd.xlane.f32.xlu0 %v1848_v12  ;;  %1159 = vmatprep.subr.msk.mxu1 %vm1852_vm11, %v1272_v42 }
 0x142   :  { %1160 = vmatpush3.msk.msra.mxu1 %vm1852_vm11, %v1272_v42 }
 0x143   :  { %1161 = vmatprep.subr.msk.mxu1 %vm493_vm14, %v1272_v42 }
 0x144   :  { %1162 = vmatpush3.msk.msra.mxu1 %vm493_vm14, %v1272_v42  ;;  %801 = vadd.xlane.f32.xlu1 %v1881_v35 }
 0x145   :  { %799 = vadd.xlane.f32.xlu0 %v1888_v32  ;;  %1163 = vmatprep.subr.msk.mxu1 %vm492_vm15, %v1272_v42 }
 0x146   :  { %1164 = vmatpush3.msk.msra.mxu1 %vm492_vm15, %v1272_v42 }
 0x147   :  { %1165 = vmatprep.subr.msk.mxu1 %vm1858_vm12, %v1272_v42 }
 0x148   :  { %1166 = vmatpush3.msk.msra.mxu1 %vm1858_vm12, %v1272_v42  ;;  %805 = vadd.xlane.f32.xlu1 %v1899_v8 }
 0x149   :  { %803 = vadd.xlane.f32.xlu0 %v1906_v7  ;;  %1167 = vmatprep.subr.msk.mxu1 %vm1868_vm13, %v1272_v42 }
 0x14a   :  { %1168 = vmatpush3.msk.msra.mxu1 %vm1868_vm13, %v1272_v42 }
 0x14b   :  { %1169 = vmatprep.subr.msk.mxu1 %vm1810_vm8, %v1272_v42 }
 0x14c   :  { %1170 = vmatpush3.msk.msra.mxu1 %vm1810_vm8, %v1272_v42  ;;  %809 = vadd.xlane.f32.xlu1 %v1921_v21 }
 0x14d   :  { %807 = vadd.xlane.f32.xlu0 %v1930_v57  ;;  %1171 = vmatprep.subr.msk.mxu1 %vm1820_vm9, %v1272_v42 }
 0x14e   :  { %1172 = vmatpush3.msk.msra.mxu1 %vm1820_vm9, %v1272_v42 }
 0x14f   :  { %1173 = vmatprep.subr.msk.mxu1 %vm1764_vm4, %v1272_v42 }
 0x150   :  { %1174 = vmatpush3.msk.msra.mxu1 %vm1764_vm4, %v1272_v42  ;;  %813 = vadd.xlane.f32.xlu1 %v1945_v53  ;;  %vm773_vm4 = vcmask 1040384  }
 0x151   :  { %811 = vadd.xlane.f32.xlu0 %v1954_v55  ;;  %1175 = vmatprep.subr.msk.mxu1 %vm1774_vm5, %v1272_v42  ;;  %v774_v41 = vsel %vm773_vm4, %v1634_v11, 0.0 }
 0x152   :  { %1176 = vmatpush3.msk.msra.mxu1 %vm1774_vm5, %v1272_v42 }
 0x153   :  { %1177 = vmatprep.subr.msk.mxu1 %vm1729_vm1, %v1272_v42 }
 0x154   :  { %1178 = vmatpush3.msk.msra.mxu1 %vm1729_vm1, %v1272_v42  ;;  %817 = vadd.xlane.f32.xlu1 %v1969_v4 }
 0x155   :  { %815 = vadd.xlane.f32.xlu0 %v1978_v22  ;;  %1179 = vmatprep.subr.msk.mxu1 %vm1735_vm2, %v1272_v42 }
 0x156   :  { %1180 = vmatpush3.msk.msra.mxu1 %vm1735_vm2, %v1272_v42 }
 0x158   :  { %775 = vadd.xlane.f32.xlu1 %v774_v41 }
 0x182   :  { %580 = vxpose.xlu0.b32.start [1/16] %v1366_v13, 128 }
 0x186   :  { %581 = vxpose.xlu0.b32.cont [2/16] %v1393_v20, 128 }
 0x18a   :  { %582 = vxpose.xlu0.b32.cont [3/16] %v1383_v16, 128 }
 0x18e   :  { %583 = vxpose.xlu0.b32.cont [4/16] %v1407_v24, 128 }
 0x192   :  { %584 = vxpose.xlu0.b32.cont [5/16] %v1424_v33, 128 }
 0x196   :  { %585 = vxpose.xlu0.b32.cont [6/16] %v1435_v36, 128 }
 0x19a   :  { %586 = vxpose.xlu0.b32.cont [7/16] %v1444_v43, 128 }
 0x19e   :  { %587 = vxpose.xlu0.b32.cont [8/16] %v1449_v44, 128 }
 0x1a2   :  { %588 = vxpose.xlu0.b32.cont [9/16] %v1458_v51, 128 }
 0x1a6   :  { %589 = vxpose.xlu0.b32.cont [10/16] %v1463_v52, 128 }
 0x1aa   :  { %590 = vxpose.xlu0.b32.cont [11/16] %v1477_v59, 128 }
 0x1ae   :  { %591 = vxpose.xlu0.b32.cont [12/16] %v1483_v60, 128 }
 0x1b2   :  { %592 = vxpose.xlu0.b32.cont [13/16] %v1499_v9, 128 }
 0x1b6   :  { %593 = vxpose.xlu0.b32.cont [14/16] %v1505_v3, 128 }
 0x1ba   :  { %594 = vxpose.xlu0.b32.cont [15/16] %v1519_v14, 128 }
 0x1be   :  { %595 = vxpose.xlu0.b32.end [16/16] %v1525_v0, 128 }
 0x1c1   :  { %v790_v13 = vpop.xlane.xlu1 %789 }
 0x1c2   :  { %v821_v16 = vmul.f32 0.0078125, %v790_v13  ;;  %532 = vxpose.xlu0.b32.start [1/16] %v1750_v29, 128  ;;  %v788_v20 = vpop.xlane.xlu0 %787 }
 0x1c3   :  { %v820_v24 = vmul.f32 0.0078125, %v788_v20 }
 0x1c4   :  { %v837_v33 = vadd.f32 1e-10, %v821_v16 }
 0x1c5   :  { %v836_v36 = vadd.f32 1e-10, %v820_v24  ;;  %v794_v43 = vpop.xlane.xlu1 %793 }
 0x1c6   :  { %1216 = vlog2.f32 %v837_v33  ;;  %v823_v44 = vmul.f32 0.0078125, %v794_v43  ;;  %533 = vxpose.xlu0.b32.cont [2/16] %v1745_v39, 128  ;;  %v792_v51 = vpop.xlane.xlu0 %791 }
 0x1c7   :  { %1218 = vlog2.f32 %v836_v36  ;;  %v822_v52 = vmul.f32 0.0078125, %v792_v51 }
 0x1c8   :  { %v839_v59 = vadd.f32 1e-10, %v823_v44 }
 0x1c9   :  { %v838_v60 = vadd.f32 1e-10, %v822_v52  ;;  %v798_v9 = vpop.xlane.xlu1 %797 }
 0x1ca   :  { %1220 = vlog2.f32 %v839_v59  ;;  %v2006_v3 = vmul.f32 0.0078125, %v798_v9  ;;  %534 = vxpose.xlu0.b32.cont [3/16] %v1800_v25, 128  ;;  %v796_v14 = vpop.xlane.xlu0 %795 }
 0x1cb   :  { %1222 = vlog2.f32 %v838_v60  ;;  %v2009_v0 = vmul.f32 0.0078125, %v796_v14 }
 0x1cc   :  { %v841_v11 = vadd.f32 1e-10, %v2006_v3 }
 0x1cd   :  { %v840_v10 = vadd.f32 1e-10, %v2009_v0  ;;  %v802_v34 = vpop.xlane.xlu1 %801 }
 0x1ce   :  { %1224 = vlog2.f32 %v841_v11  ;;  %v2013_v42 = vmul.f32 0.0078125, %v802_v34  ;;  %535 = vxpose.xlu0.b32.cont [4/16] %v1791_v26, 128  ;;  %v800_v27 = vpop.xlane.xlu0 %799 }
 0x1cf   :  { %1226 = vlog2.f32 %v840_v10  ;;  %v2016_v39 = vmul.f32 0.0078125, %v800_v27 }
 0x1d0   :  { %v843_v29 = vadd.f32 1e-10, %v2013_v42 }
 0x1d1   :  { %v842_v61 = vadd.f32 1e-10, %v2016_v39  ;;  %v806_v37 = vpop.xlane.xlu1 %805 }
 0x1d2   :  { %1228 = vlog2.f32 %v843_v29  ;;  %v2020_v40 = vmul.f32 0.0078125, %v806_v37  ;;  %536 = vxpose.xlu0.b32.cont [5/16] %v1848_v12, 128  ;;  %v804_v47 = vpop.xlane.xlu0 %803 }
 0x1d3   :  { %v1217_v25 = vpop.eup %1216  ;;  %1230 = vlog2.f32 %v842_v61  ;;  %v2023_v2 = vmul.f32 0.0078125, %v804_v47 }
 0x1d4   :  { %v1219_v26 = vpop.eup %1218  ;;  %v855_v19 = vmul.f32 0.6931472, %v1217_v25  ;;  %v845_v31 = vadd.f32 1e-10, %v2020_v40 }
 0x1d5   :  { %v853_v54 = vmul.f32 0.6931472, %v1219_v26  ;;  %v844_v17 = vadd.f32 1e-10, %v2023_v2  ;;  %v810_v5 = vpop.xlane.xlu1 %809 }
 0x1d6   :  { %v885_v56 = vmul.f32 %v855_v19, %v821_v16  ;;  %1232 = vlog2.f32 %v845_v31  ;;  %v2027_v28 = vmul.f32 0.0078125, %v810_v5  ;;  %537 = vxpose.xlu0.b32.cont [6/16] %v1839_v48, 128  ;;  %v808_v62 = vpop.xlane.xlu0 %807 }
 0x1d7   :  { %v1221_v12 = vpop.eup %1220  ;;  %v884_v45 = vmul.f32 %v853_v54, %v820_v24  ;;  %1234 = vlog2.f32 %v844_v17  ;;  %v2030_v58 = vmul.f32 0.0078125, %v808_v62 }
 0x1d8   :  { %v1223_v63 = vpop.eup %1222  ;;  %v859_v23 = vmul.f32 0.6931472, %v1221_v12  ;;  %v847_v15 = vadd.f32 1e-10, %v2027_v28  ;;  %v902_v18 = vsel %vm900_vm0, %v885_v56, 0.0 }
 0x1d9   :  { %v901_v38 = vsel %vm900_vm0, %v884_v45, 0.0  ;;  %v857_v6 = vmul.f32 0.6931472, %v1223_v63  ;;  %v846_v1 = vadd.f32 1e-10, %v2030_v58  ;;  %v814_v41 = vpop.xlane.xlu1 %813 }
 0x1da   :  { %v887_v13 = vmul.f32 %v859_v23, %v823_v44  ;;  %1236 = vlog2.f32 %v847_v15  ;;  %v2036_v48 = vmul.f32 0.0078125, %v814_v41  ;;  %538 = vxpose.xlu0.b32.cont [7/16] %v1888_v32, 128  ;;  %v812_v16 = vpop.xlane.xlu0 %811  ;;  %v903_v43 = vadd.f32 %v902_v18, %v901_v38 }
 0x1db   :  { %v1225_v20 = vpop.eup %1224  ;;  %v886_v24 = vmul.f32 %v857_v6, %v822_v52  ;;  %1238 = vlog2.f32 %v846_v1  ;;  %v2039_v33 = vmul.f32 0.0078125, %v812_v16 }
 0x1dc   :  { %v1227_v36 = vpop.eup %1226  ;;  %v863_v51 = vmul.f32 0.6931472, %v1225_v20  ;;  %v849_v59 = vadd.f32 1e-10, %v2036_v48  ;;  %v906_v11 = vsel %vm900_vm0, %v887_v13, 0.0 }
 0x1dd   :  { %v904_v60 = vsel %vm900_vm0, %v886_v24, 0.0  ;;  %v861_v9 = vmul.f32 0.6931472, %v1227_v36  ;;  %v848_v44 = vadd.f32 1e-10, %v2039_v33  ;;  %v818_v14 = vpop.xlane.xlu1 %817 }
 0x1de   :  { %v905_v32 = vadd.f32 %v904_v60, %v903_v43  ;;  %1240 = vlog2.f32 %v849_v59  ;;  %v2045_v10 = vmul.f32 0.0078125, %v818_v14  ;;  %539 = vxpose.xlu0.b32.cont [8/16] %v1881_v35, 128  ;;  %v816_v52 = vpop.xlane.xlu0 %815  ;;  %v889_v27 = vmul.f32 %v863_v51, %v2006_v3 }
 0x1df   :  { %v1229_v34 = vpop.eup %1228  ;;  %v888_v29 = vmul.f32 %v861_v9, %v2009_v0  ;;  %1242 = vlog2.f32 %v848_v44  ;;  %v2050_v61 = vmul.f32 0.0078125, %v816_v52 }
 0x1e0   :  { %v1231_v37 = vpop.eup %1230  ;;  %v907_v47 = vadd.f32 %v906_v11, %v905_v32  ;;  %v867_v25 = vmul.f32 0.6931472, %v1229_v34  ;;  %v851_v26 = vadd.f32 1e-10, %v2045_v10  ;;  %v910_v0 = vsel %vm900_vm0, %v889_v27, 0.0 }
 0x1e1   :  { %v908_v19 = vsel %vm900_vm0, %v888_v29, 0.0  ;;  %v865_v31 = vmul.f32 0.6931472, %v1231_v37  ;;  %v850_v54 = vadd.f32 1e-10, %v2050_v61  ;;  %v776_v35 = vpop.xlane.xlu1 %775 }
 0x1e2   :  { %v909_v17 = vadd.f32 %v908_v19, %v907_v47  ;;  %1244 = vlog2.f32 %v851_v26  ;;  %v777_v5 = vrot.slane %v776_v35, 4  ;;  %540 = vxpose.xlu0.b32.cont [9/16] %v1906_v7, 128  ;;  %v891_v56 = vmul.f32 %v867_v25, %v2013_v42 }
 0x1e3   :  { %v1233_v3 = vpop.eup %1232  ;;  %v890_v62 = vmul.f32 %v865_v31, %v2016_v39  ;;  %1246 = vlog2.f32 %v850_v54 }
 0x1e4   :  { %v1235_v12 = vpop.eup %1234  ;;  %v911_v45 = vadd.f32 %v910_v0, %v909_v17  ;;  %v871_v63 = vmul.f32 0.6931472, %v1233_v3  ;;  %v778_v23 = vadd.f32 %v777_v5, %v776_v35  ;;  %v914_v1 = vsel %vm900_vm0, %v891_v56, 0.0 }
 0x1e5   :  { %v912_v15 = vsel %vm900_vm0, %v890_v62, 0.0  ;;  %v869_v18 = vmul.f32 0.6931472, %v1235_v12 }
 0x1e6   :  { %v913_v38 = vadd.f32 %v912_v15, %v911_v45  ;;  %v779_v6 = vrot.slane %v778_v23, 2  ;;  %541 = vxpose.xlu0.b32.cont [10/16] %v1899_v8, 128  ;;  %v893_v41 = vmul.f32 %v871_v63, %v2020_v40 }
 0x1e7   :  { %v1237_v7 = vpop.eup %1236  ;;  %v892_v42 = vmul.f32 %v869_v18, %v2023_v2  ;;  %v2342_v18 = vld [vmem:[#allocation5_spill] sm:$0xff] }
 0x1e8   :  { %v1239_v39 = vpop.eup %1238  ;;  %v915_v13 = vadd.f32 %v914_v1, %v913_v38  ;;  %v875_v16 = vmul.f32 0.6931472, %v1237_v7  ;;  %v780_v20 = vadd.f32 %v779_v6, %v778_v23  ;;  %v918_v8 = vsel %vm900_vm0, %v893_v41, 0.0  ;;  %v2343_v38 = vld [vmem:[#allocation6_spill] sm:$0xff]  ;;  %v2344_v6 = vld [vmem:[#allocation8_spill] sm:$0xff] }
 0x1e9   :  { %v916_v24 = vsel %vm900_vm0, %v892_v42, 0.0  ;;  %v873_v36 = vmul.f32 0.6931472, %v1239_v39  ;;  %v2347_v7 = vld [vmem:[#allocation10_spill] sm:$0xff]  ;;  %v2348_v1 = vld [vmem:[#allocation12_spill] sm:$0xff]  ;;  %v2349_v42 = vld [vmem:[#allocation11_spill] sm:$0xff] }
 0x1ea   :  { %v917_v43 = vadd.f32 %v916_v24, %v915_v13  ;;  %542 = vxpose.xlu0.b32.cont [11/16] %v1930_v57, 128  ;;  %v781_v51 = vrot.slane %v780_v20, 1  ;;  %v895_v60 = vmul.f32 %v875_v16, %v2027_v28  ;;  %v2350_v13 = vld [vmem:[#allocation13_spill] sm:$0xff] }
 0x1eb   :  { %v1241_v59 = vpop.eup %1240  ;;  %v894_v40 = vmul.f32 %v873_v36, %v2030_v58  ;;  %v2352_v36 = vld [vmem:[#allocation16_spill] sm:$0xff] }
 0x1ec   :  { %v1243_v9 = vpop.eup %1242  ;;  %v919_v2 = vadd.f32 %v918_v8, %v917_v43  ;;  %v879_v44 = vmul.f32 0.6931472, %v1241_v59  ;;  %v782_v14 = vadd.f32 %v781_v51, %v780_v20  ;;  %v922_v34 = vsel %vm900_vm0, %v895_v60, 0.0  ;;  %v2351_v20 = vld [vmem:[#allocation14_spill] sm:$0xff]  ;;  %v2353_v51 = vld [vmem:[#allocation15_spill] sm:$0xff] }
 0x1ed   :  { %v920_v11 = vsel %vm900_vm0, %v894_v40, 0.0  ;;  %v877_v32 = vmul.f32 0.6931472, %v1243_v9 }
 0x1ee   :  { %v921_v52 = vadd.f32 %v920_v11, %v919_v2  ;;  %543 = vxpose.xlu0.b32.cont [12/16] %v1921_v21, 128  ;;  %1207 = vpush %v782_v14  ;;  %v897_v27 = vmul.f32 %v879_v44, %v2036_v48 }
 0x1ef   :  { %v1245_v57 = vpop.eup %1244  ;;  %v896_v28 = vmul.f32 %v877_v32, %v2039_v33 }
 0x1f0   :  { %v1247_v29 = vpop.eup %1246  ;;  %v923_v58 = vadd.f32 %v922_v34, %v921_v52  ;;  %v883_v37 = vmul.f32 0.6931472, %v1245_v57  ;;  %v926_v19 = vsel %vm900_vm0, %v897_v27, 0.0 }
 0x1f1   :  { %v924_v47 = vsel %vm900_vm0, %v896_v28, 0.0  ;;  %v881_v25 = vmul.f32 0.6931472, %v1247_v29 }
 0x1f2   :  { %v925_v26 = vadd.f32 %v924_v47, %v923_v58  ;;  %544 = vxpose.xlu0.b32.cont [13/16] %v1954_v55, 128  ;;  %v899_v21 = vmul.f32 %v883_v37, %v2045_v10 }
 0x1f3   :  { %v898_v31 = vmul.f32 %v881_v25, %v2050_v61 }
 0x1f4   :  { %v927_v54 = vadd.f32 %v926_v19, %v925_v26  ;;  %v930_v35 = vsel %vm900_vm0, %v899_v21, 0.0 }
 0x1f5   :  { %v928_v48 = vsel %vm900_vm0, %v898_v31, 0.0 }
 0x1f6   :  { %545 = vxpose.xlu0.b32.cont [14/16] %v1945_v53, 128  ;;  %v929_v33 = vadd.f32 %v928_v48, %v927_v54 }
 0x1f8   :  { %v931_v17 = vadd.f32 %v930_v35, %v929_v33 }
 0x1fa   :  { %546 = vxpose.xlu0.b32.cont [15/16] %v1978_v22, 128  ;;  %932 = vadd.xlane.f32.xlu1 %v931_v17 }
 0x1fe   :  { %547 = vxpose.xlu0.b32.end [16/16] %v1969_v4, 128  ;;  %v596_v55 = vpop.trf.xlu0 }
 0x1ff   :  { %1181 = vmatprep.mubr.f32.mxu1 %v596_v55 }
 0x202   :  { %v597_v5 = vpop.trf.xlu0 }
 0x203   :  { %1182 = vmatmul.mubr.f32.vlgmr.msra.gmra.mxu1 %v597_v5 }
 0x206   :  { %v598_v10 = vpop.trf.xlu0 }
 0x207   :  { %1184 = vmatprep.mubr.f32.mxu1 %v598_v10 }
 0x20a   :  { %v599_v61 = vpop.trf.xlu0 }
 0x20b   :  { %1185 = vmatmul.mubr.f32.gmra.mxu1 %v599_v61 }
 0x20e   :  { %v600_v3 = vpop.trf.xlu0 }
 0x20f   :  { %1187 = vmatprep.mubr.f32.mxu1 %v600_v3 }
 0x212   :  { %v601_v53 = vpop.trf.xlu0 }
 0x213   :  { %1188 = vmatmul.mubr.f32.gmra.mxu1 %v601_v53 }
 0x216   :  { %v602_v0 = vpop.trf.xlu0 }
 0x217   :  { %1190 = vmatprep.mubr.f32.mxu1 %v602_v0 }
 0x21a   :  { %v603_v56 = vpop.trf.xlu0 }
 0x21b   :  { %1191 = vmatmul.mubr.f32.gmra.mxu1 %v603_v56 }
 0x21e   :  { %v604_v22 = vpop.trf.xlu0 }
 0x21f   :  { %1193 = vmatprep.mubr.f32.mxu1 %v604_v22 }
 0x222   :  { %v605_v62 = vpop.trf.xlu0 }
 0x223   :  { %1194 = vmatmul.mubr.f32.gmra.mxu1 %v605_v62 }
 0x226   :  { %v606_v4 = vpop.trf.xlu0 }
 0x227   :  { %1196 = vmatprep.mubr.f32.mxu1 %v606_v4 }
 0x22a   :  { %v607_v12 = vpop.trf.xlu0 }
 0x22b   :  { %1197 = vmatmul.mubr.f32.gmra.mxu1 %v607_v12 }
 0x22d   :  { %327 = vxpose.xlu1.b32.start [1/16] %v1548_v30, 128 }
 0x22e   :  { %v608_v45 = vpop.trf.xlu0 }
 0x22f   :  { %1199 = vmatprep.mubr.f32.mxu1 %v608_v45 }
 0x231   :  { %328 = vxpose.xlu1.b32.cont [2/16] %v1556_v46, 128  ;;  %v2345_v46 = vld [vmem:[#allocation7_spill] sm:$0xff] }
 0x232   :  { %v609_v63 = vpop.trf.xlu0 }
 0x233   :  { %1200 = vmatmul.mubr.f32.gmra.mxu1 %v609_v63 }
 0x235   :  { %329 = vxpose.xlu1.b32.cont [3/16] %v1562_v50, 128 }
 0x236   :  { %v610_v23 = vpop.trf.xlu0 }
 0x237   :  { %1202 = vmatprep.mubr.f32.mxu1 %v610_v23 }
 0x239   :  { %330 = vxpose.xlu1.b32.cont [4/16] %v1560_v49, 128  ;;  %v2346_v49 = vld [vmem:[#allocation9_spill] sm:$0xff] }
 0x23a   :  { %v611_v15 = vpop.trf.xlu0 }
 0x23b   :  { %1203 = vmatmul.mubr.f32.gmra.mxu1 %v611_v15 }
 0x23d   :  { %331 = vxpose.xlu1.b32.cont [5/16] %v2342_v18, 128 }
 0x23e   :  { %v548_v30 = vpop.trf.xlu0 }
 0x23f   :  { %564 = vst [vmem:[%s2258_s4] sm:$0xff] %v548_v30 }
 0x241   :  { %332 = vxpose.xlu1.b32.cont [6/16] %v2343_v38, 128 }
 0x242   :  { %v549_v50 = vpop.trf.xlu0 }
 0x243   :  { %565 = vst [vmem:[%s2258_s4 + $0x8] sm:$0xff] %v549_v50 }
 0x245   :  { %333 = vxpose.xlu1.b32.cont [7/16] %v2344_v6, 128 }
 0x246   :  { %v550_v41 = vpop.trf.xlu0 }
 0x247   :  { %566 = vst [vmem:[%s2258_s4 + $0x10] sm:$0xff] %v550_v41 }
 0x249   :  { %334 = vxpose.xlu1.b32.cont [8/16] %v2345_v46, 128 }
 0x24a   :  { %v551_v39 = vpop.trf.xlu0 }
 0x24b   :  { %567 = vst [vmem:[%s2258_s4 + $0x18] sm:$0xff] %v551_v39 }
 0x24d   :  { %335 = vxpose.xlu1.b32.cont [9/16] %v2346_v49, 128 }
 0x24e   :  { %v552_v16 = vpop.trf.xlu0 }
 0x24f   :  { %568 = vst [vmem:[%s2258_s4 + $0x20] sm:$0xff] %v552_v16 }
 0x251   :  { %336 = vxpose.xlu1.b32.cont [10/16] %v2347_v7, 128 }
 0x252   :  { %v553_v24 = vpop.trf.xlu0 }
 0x253   :  { %569 = vst [vmem:[%s2258_s4 + $0x28] sm:$0xff] %v553_v24 }
 0x255   :  { %337 = vxpose.xlu1.b32.cont [11/16] %v2348_v1, 128 }
 0x256   :  { %v554_v43 = vpop.trf.xlu0 }
 0x257   :  { %570 = vst [vmem:[%s2258_s4 + $0x30] sm:$0xff] %v554_v43 }
 0x259   :  { %338 = vxpose.xlu1.b32.cont [12/16] %v2349_v42, 128 }
 0x25a   :  { %v555_v59 = vpop.trf.xlu0 }
 0x25b   :  { %571 = vst [vmem:[%s2258_s4 + $0x38] sm:$0xff] %v555_v59 }
 0x25d   :  { %339 = vxpose.xlu1.b32.cont [13/16] %v2350_v13, 128 }
 0x25e   :  { %v556_v8 = vpop.trf.xlu0 }
 0x25f   :  { %572 = vst [vmem:[%s2258_s4 + $0x40] sm:$0xff] %v556_v8 }
 0x261   :  { %340 = vxpose.xlu1.b32.cont [14/16] %v2351_v20, 128 }
 0x262   :  { %v557_v60 = vpop.trf.xlu0 }
 0x263   :  { %573 = vst [vmem:[%s2258_s4 + $0x48] sm:$0xff] %v557_v60 }
 0x265   :  { %341 = vxpose.xlu1.b32.cont [15/16] %v2352_v36, 128 }
 0x266   :  { %v558_v40 = vpop.trf.xlu0 }
 0x267   :  { %574 = vst [vmem:[%s2258_s4 + $0x50] sm:$0xff] %v558_v40 }
 0x269   :  { %342 = vxpose.xlu1.b32.end [16/16] %v2353_v51, 128 }
 0x26a   :  { %v559_v9 = vpop.trf.xlu0 }
 0x26b   :  { %575 = vst [vmem:[%s2258_s4 + $0x58] sm:$0xff] %v559_v9 }
 0x26e   :  { %v560_v2 = vpop.trf.xlu0 }
 0x26f   :  { %576 = vst [vmem:[%s2258_s4 + $0x60] sm:$0xff] %v560_v2 }
 0x272   :  { %v561_v44 = vpop.trf.xlu0 }
 0x273   :  { %577 = vst [vmem:[%s2258_s4 + $0x68] sm:$0xff] %v561_v44 }
 0x276   :  { %v562_v34 = vpop.trf.xlu0 }
 0x277   :  { %578 = vst [vmem:[%s2258_s4 + $0x70] sm:$0xff] %v562_v34 }
 0x283   :  { %v933_v14 = vpop.xlane.xlu1 %932 }
 0x284   :  { %v934_v11 = vrot.slane %v933_v14, 4 }
 0x286   :  { %v935_v32 = vadd.f32 %v934_v11, %v933_v14 }
 0x288   :  { %v936_v52 = vrot.slane %v935_v32, 2 }
 0x28a   :  { %v937_v57 = vadd.f32 %v936_v52, %v935_v32 }
 0x28c   :  { %v938_v27 = vrot.slane %v937_v57, 1 }
 0x28e   :  { %v939_v28 = vadd.f32 %v938_v27, %v937_v57 }
 0x28f   :  { %1261 = shalt.err (!%p1258_p4)
}
 0x290   :  { %982 = dma.vmem_to_hbm [thread:$0]  %s980_s16, 16, %s2259_s5, [#allocation3]   ;;  %v563_v29 = vpop.trf.xlu0  ;;  %1209 = vpush %v939_v28  ;;  %v2354_v30 = vlaneseq }
 0x291   :  { %579 = vst [vmem:[%s2258_s4 + $0x78] sm:$0xff] %v563_v29  ;;  %s2169_s8 = spop %1207 }
 0x292   :  { %s784_s5 = smul.f32 6.1035156e-05, %s2169_s8  ;;  %v947_v46 = vand.u32 127, %v2354_v30 }
 0x294   :  { %s785_s4 = smul.f32 0.25, %s784_s5  ;;  %vm948_vm1 = vcmp.eq.s32.totalorder %v947_v46, 0  ;;  %v949_v49 = vstv %s784_s5  ;;  %vm951_vm2 = vcmp.eq.s32.totalorder %v947_v46, 1  ;;  %vm954_vm3 = vcmp.eq.s32.totalorder %v947_v46, 2 }
 0x295   :  { %v950_v1 = vsel %vm948_vm1, %v949_v49, 0.0  ;;  %v952_v41 = vsel %vm951_vm2, %v949_v49, 0.0  ;;  %vm958_vm5 = vcmp.eq.s32.totalorder %v947_v46, 3  ;;  %vm962_vm6 = vcmp.eq.s32.totalorder %v947_v46, 4 }
 0x296   :  { %s786_s7 = sadd.f32 %s785_s4, %s784_s5  ;;  %v955_v42 = vstv %s785_s4  ;;  %v953_v13 = vadd.f32 %v952_v41, %v950_v1 }
 0x297   :  { %v956_v16 = vsel %vm954_vm3, %v955_v42, 0.0 }
 0x298   :  { %v959_v20 = vstv %s786_s7  ;;  %v957_v24 = vadd.f32 %v956_v16, %v953_v13 }
 0x299   :  { %v960_v36 = vsel %vm958_vm5, %v959_v20, 0.0 }
 0x29a   :  { %v961_v43 = vadd.f32 %v960_v36, %v957_v24 }
 0x2a9   :  { %v343_v58 = vpop.trf.xlu1 }
 0x2aa   :  { %359 = vst [vmem:[%s2257_s3] sm:$0xff] %v343_v58 }
 0x2ad   :  { %v344_v37 = vpop.trf.xlu1 }
 0x2ae   :  { %360 = vst [vmem:[%s2257_s3 + $0x8] sm:$0xff] %v344_v37 }
 0x2b1   :  { %v345_v47 = vpop.trf.xlu1 }
 0x2b2   :  { %361 = vst [vmem:[%s2257_s3 + $0x10] sm:$0xff] %v345_v47 }
 0x2b5   :  { %v346_v25 = vpop.trf.xlu1 }
 0x2b6   :  { %362 = vst [vmem:[%s2257_s3 + $0x18] sm:$0xff] %v346_v25 }
 0x2b9   :  { %v347_v26 = vpop.trf.xlu1 }
 0x2ba   :  { %363 = vst [vmem:[%s2257_s3 + $0x20] sm:$0xff] %v347_v26 }
 0x2bd   :  { %v348_v19 = vpop.trf.xlu1 }
 0x2be   :  { %364 = vst [vmem:[%s2257_s3 + $0x28] sm:$0xff] %v348_v19 }
 0x2c1   :  { %s1210_s9 = spop %1209  ;;  %v349_v21 = vpop.trf.xlu1 }
 0x2c2   :  { %s941_s10 = ssub.f32 0.0, %s1210_s9  ;;  %365 = vst [vmem:[%s2257_s3 + $0x30] sm:$0xff] %v349_v21 }
 0x2c3   :  { %v1183_v31 = vpop.f32.mrf.mxu1 }
 0x2c4   :  { %v942_v54 = vstv %s941_s10  ;;  %758 = vst [vmem:[%s2256_s2 + $0x8] sm:$0xff] %v1183_v31 }
 0x2c5   :  { %v943_v48 = vmul.f32 1.442695, %v942_v54  ;;  %v678_v33 = vpop.f32.mrf.mxu1  ;;  %v350_v35 = vpop.trf.xlu1 }
 0x2c6   :  { %757 = vst [vmem:[%s2256_s2] sm:$0xff] %v678_v33  ;;  %366 = vst [vmem:[%s2257_s3 + $0x38] sm:$0xff] %v350_v35 }
 0x2c7   :  { %1248 = vpow2.f32 %v943_v48 }
 0x2c9   :  { %v351_v17 = vpop.trf.xlu1 }
 0x2ca   :  { %367 = vst [vmem:[%s2257_s3 + $0x40] sm:$0xff] %v351_v17 }
 0x2cb   :  { %v1186_v55 = vpop.f32.mrf.mxu1 }
 0x2cc   :  { %760 = vst [vmem:[%s2256_s2 + $0x18] sm:$0xff] %v1186_v55 }
 0x2cd   :  { %v688_v5 = vpop.f32.mrf.mxu1  ;;  %v352_v10 = vpop.trf.xlu1 }
 0x2ce   :  { %759 = vst [vmem:[%s2256_s2 + $0x10] sm:$0xff] %v688_v5  ;;  %368 = vst [vmem:[%s2257_s3 + $0x48] sm:$0xff] %v352_v10 }
 0x2d1   :  { %v353_v61 = vpop.trf.xlu1 }
 0x2d2   :  { %369 = vst [vmem:[%s2257_s3 + $0x50] sm:$0xff] %v353_v61 }
 0x2d3   :  { %v1189_v3 = vpop.f32.mrf.mxu1 }
 0x2d4   :  { %v1249_v53 = vpop.eup %1248  ;;  %762 = vst [vmem:[%s2256_s2 + $0x28] sm:$0xff] %v1189_v3 }
 0x2d5   :  { %1211 = vpush %v1249_v53  ;;  %v698_v0 = vpop.f32.mrf.mxu1  ;;  %v354_v56 = vpop.trf.xlu1 }
 0x2d6   :  { %761 = vst [vmem:[%s2256_s2 + $0x20] sm:$0xff] %v698_v0  ;;  %370 = vst [vmem:[%s2257_s3 + $0x58] sm:$0xff] %v354_v56 }
 0x2d9   :  { %v355_v22 = vpop.trf.xlu1 }
 0x2da   :  { %371 = vst [vmem:[%s2257_s3 + $0x60] sm:$0xff] %v355_v22 }
 0x2db   :  { %v1192_v62 = vpop.f32.mrf.mxu1 }
 0x2dc   :  { %764 = vst [vmem:[%s2256_s2 + $0x38] sm:$0xff] %v1192_v62 }
 0x2dd   :  { %v708_v4 = vpop.f32.mrf.mxu1  ;;  %v356_v12 = vpop.trf.xlu1 }
 0x2de   :  { %763 = vst [vmem:[%s2256_s2 + $0x30] sm:$0xff] %v708_v4  ;;  %372 = vst [vmem:[%s2257_s3 + $0x68] sm:$0xff] %v356_v12 }
 0x2e1   :  { %v357_v45 = vpop.trf.xlu1 }
 0x2e2   :  { %373 = vst [vmem:[%s2257_s3 + $0x70] sm:$0xff] %v357_v45 }
 0x2e3   :  { %v1195_v63 = vpop.f32.mrf.mxu1 }
 0x2e4   :  { %766 = vst [vmem:[%s2256_s2 + $0x48] sm:$0xff] %v1195_v63 }
 0x2e5   :  { %v718_v23 = vpop.f32.mrf.mxu1  ;;  %v358_v15 = vpop.trf.xlu1 }
 0x2e6   :  { %765 = vst [vmem:[%s2256_s2 + $0x40] sm:$0xff] %v718_v23  ;;  %374 = vst [vmem:[%s2257_s3 + $0x78] sm:$0xff] %v358_v15 }
 0x2eb   :  { %v1198_v18 = vpop.f32.mrf.mxu1 }
 0x2ec   :  { %768 = vst [vmem:[%s2256_s2 + $0x58] sm:$0xff] %v1198_v18 }
 0x2ed   :  { %v728_v38 = vpop.f32.mrf.mxu1 }
 0x2ee   :  { %767 = vst [vmem:[%s2256_s2 + $0x50] sm:$0xff] %v728_v38 }
 0x2f3   :  { %v1201_v6 = vpop.f32.mrf.mxu1 }
 0x2f4   :  { %770 = vst [vmem:[%s2256_s2 + $0x68] sm:$0xff] %v1201_v6 }
 0x2f5   :  { %v738_v50 = vpop.f32.mrf.mxu1 }
 0x2f6   :  { %769 = vst [vmem:[%s2256_s2 + $0x60] sm:$0xff] %v738_v50 }
 0x2fb   :  { %v1204_v7 = vpop.f32.mrf.mxu1 }
 0x2fc   :  { %772 = vst [vmem:[%s2256_s2 + $0x78] sm:$0xff] %v1204_v7 }
 0x2fd   :  { %v748_v39 = vpop.f32.mrf.mxu1 }
 0x2fe   :  { %771 = vst [vmem:[%s2256_s2 + $0x70] sm:$0xff] %v748_v39 }
 0x306   :  { %s1212_s10 = spop %1211 }
 0x307   :  { %v963_v51 = vstv %s1212_s10 }
 0x308   :  { %v964_v59 = vsel %vm962_vm6, %v963_v51, 0.0 }
 0x309   :  { %v965_v8 = vadd.f32 %v964_v59, %v961_v43 }
 0x30b   :  { %966 = vst [vmem:[%s2260_s6] sm:$0x1] %v965_v8 }
 0x30c   :  { %1270 = dma.done.wait [#allocation3], 16  }
 0x30d   :  { %1271 = vsyncadd [#allocation3], 4294967280 }
 0x30e   :  { %996 = vsyncpa [#allocation3], 1 }

</bundles_post_ra>
